<compile_context>
chip_gen: v5e
topology: v5e:2x2
jax: 0.10.0
libtpu: 0.0.40
codegen_flags: <defaults>
</compile_context>

<pallas_src>
import jax
import jax.numpy as jnp
from jax.experimental import pallas as pl
from jax.experimental.pallas import tpu as pltpu


def _round_up(x, m):
    return ((x + m - 1) // m) * m


def gau_kernel(x_hbm, w3_ref, scale_ref, shift_ref, out_ref, xpad_ref, sems):
    # x_hbm    : (B, Hl, Wl, C)      low features, left in HBM (pl.ANY)
    # w3_ref   : (9, C, C)           3x3 conv weight, tap = dy*3+dx, (tap, Cin, Cout)
    # scale_ref: (1, C) f32          folded BN scale * gate   (this batch)
    # shift_ref: (1, C) f32          folded BN shift * gate   (this batch)
    # out_ref  : (TR*W2, C)          flat lane-dense output block (junk cols kept)
    # xpad_ref : (TR+3, W2, C)       zero-bordered row tile (+halo) scratch
    # sems     : DMA semaphores (3,)
    b = pl.program_id(0)
    rt = pl.program_id(1)
    n_rt = pl.num_programs(1)

    TRp3, W2, C = xpad_ref.shape
    TR = TRp3 - 3
    Wl = x_hbm.shape[2]
    L = TR * W2
    row0 = rt * TR

    # ---- stage this row tile (+ halo rows) into the padded VMEM scratch ------
    # main TR rows -> scratch rows [1, TR+1), columns [1, Wl+1)
    main_cp = pltpu.make_async_copy(
        x_hbm.at[b, pl.ds(row0, TR), :, :],
        xpad_ref.at[pl.ds(1, TR), pl.ds(1, Wl), :],
        sems.at[0])
    main_cp.start()

    @pl.when(rt > 0)              # top halo row (previous tile's last row)
    def _():
        pltpu.make_async_copy(
            x_hbm.at[b, pl.ds(row0 - 1, 1), :, :],
            xpad_ref.at[pl.ds(0, 1), pl.ds(1, Wl), :],
            sems.at[1]).start()

    @pl.when(rt < n_rt - 1)       # bottom halo row (next tile's first row)
    def _():
        pltpu.make_async_copy(
            x_hbm.at[b, pl.ds(row0 + TR, 1), :, :],
            xpad_ref.at[pl.ds(TR + 1, 1), pl.ds(1, Wl), :],
            sems.at[2]).start()

    # ---- zero the pad/halo regions the DMAs never write (disjoint, so this
    #      overlaps the in-flight copies) --------------------------------------
    zrow = jnp.zeros((1, W2, C), xpad_ref.dtype)
    xpad_ref[:, 0:1, :] = jnp.zeros((TRp3, 1, C), xpad_ref.dtype)       # left pad col
    xpad_ref[:, Wl + 1:, :] = jnp.zeros((TRp3, W2 - (Wl + 1), C),
                                        xpad_ref.dtype)                 # right pad + align cols
    xpad_ref[TR + 2:TR + 3, :, :] = zrow                                # slack row

    @pl.when(rt == 0)
    def _():
        xpad_ref[0:1, :, :] = zrow            # image top zero padding

    @pl.when(rt == n_rt - 1)
    def _():
        xpad_ref[TR + 1:TR + 2, :, :] = zrow  # image bottom zero padding

    # ---- wait for the staged rows --------------------------------------------
    main_cp.wait()

    @pl.when(rt > 0)
    def _():
        pltpu.make_async_copy(
            x_hbm.at[b, pl.ds(row0 - 1, 1), :, :],
            xpad_ref.at[pl.ds(0, 1), pl.ds(1, Wl), :],
            sems.at[1]).wait()

    @pl.when(rt < n_rt - 1)
    def _():
        pltpu.make_async_copy(
            x_hbm.at[b, pl.ds(row0 + TR, 1), :, :],
            xpad_ref.at[pl.ds(TR + 1, 1), pl.ds(1, Wl), :],
            sems.at[2]).wait()

    # ---- 3x3 conv: 9 MXU matmuls on contiguous flat windows (row stride W2),
    #      tight acc += dot chain, f32 accumulation ----------------------------
    xf = xpad_ref[...].astype(w3_ref.dtype).reshape(TRp3 * W2, C)
    acc = jnp.dot(xf[0:L, :], w3_ref[0], preferred_element_type=jnp.float32)
    for tap in range(1, 9):
        dy, dx = divmod(tap, 3)
        off = dy * W2 + dx
        acc = acc + jnp.dot(xf[off:off + L, :], w3_ref[tap],
                            preferred_element_type=jnp.float32)

    # Fused BN(+gate) affine on the whole flat block, single rectangular store
    # (junk pad columns are scaled too and dropped by the wrapper slice).
    out_ref[...] = (acc * scale_ref[...] + shift_ref[...]).astype(out_ref.dtype)


def gau_forward(fms_high_nhwc, fms_low_nhwc, w1, w3, gamma, beta, rmean, rvar,
                eps=1e-5, compute_dtype=jnp.bfloat16, row_tile=None,
                pad_channels_to=128):
    B, Hh, Wh, Ch = fms_high_nhwc.shape
    _, Hl, Wl, C = fms_low_nhwc.shape
    out_dtype = fms_low_nhwc.dtype

    # ---- gate path in plain JAX (tiny; keeps the high feature map out of the kernel)
    gp = jnp.mean(fms_high_nhwc.astype(jnp.float32), axis=(1, 2))        # (B, Ch)
    gate = jax.nn.relu(gp @ w1.astype(jnp.float32))                      # (B, C)

    # ---- fold eval-mode BN and the gate into one per-(batch, channel) affine
    scale = gamma.astype(jnp.float32) / jnp.sqrt(rvar.astype(jnp.float32) + eps)
    shift = beta.astype(jnp.float32) - rmean.astype(jnp.float32) * scale
    scale_g = scale[None, :] * gate                                      # (B, C) f32
    shift_g = shift[None, :] * gate                                      # (B, C) f32

    # ---- channel padding to a lane-dense multiple of 128 (zero channels are inert)
    Cp = C
    if pad_channels_to:
        Cp = _round_up(C, pad_channels_to)
    low, w3c = fms_low_nhwc, w3
    if Cp != C:
        low = jnp.pad(low, ((0, 0), (0, 0), (0, 0), (0, Cp - C)))
        if compute_dtype is not None:
            low = low.astype(compute_dtype)       # fuse cast into the same copy
        w3c = jnp.pad(w3, ((0, 0), (0, 0), (0, Cp - C), (0, Cp - C)))
        scale_g = jnp.pad(scale_g, ((0, 0), (0, Cp - C)))
        shift_g = jnp.pad(shift_g, ((0, 0), (0, Cp - C)))
    if compute_dtype is not None:
        w3c = w3c.astype(compute_dtype)           # MXU operand dtype (kernel casts x)
    scale_g = scale_g.reshape(B, 1, Cp)
    shift_g = shift_g.reshape(B, 1, Cp)
    w3_taps = w3c.reshape(9, Cp, Cp)              # (3,3,Cin,Cout) -> (tap, Cin, Cout)

    # ---- padded flat row width: Wl + 2 halo cols, rounded up so the in-kernel
    #      flat reshape of the scratch is layout-free (8 sublanes * pack factor)
    pack = max(1, 4 // low.dtype.itemsize)
    W2 = _round_up(Wl + 2, 8 * pack)

    # ---- row tiling: keep each step's f32 accumulator around ~2 MiB
    if row_tile is None:
        budget_rows = max(1, (2 * 1024 * 1024) // (W2 * Cp * 4))
        row_tile = 1
        for d in range(1, Hl + 1):
            if Hl % d == 0 and d <= budget_rows:
                row_tile = d
    assert Hl % row_tile == 0, "row_tile must divide Hl"
    n_rt = Hl // row_tile
    L = row_tile * W2

    out_flat = pl.pallas_call(
        gau_kernel,
        out_shape=jax.ShapeDtypeStruct((B, Hl * W2, Cp), out_dtype),
        grid=(B, n_rt),
        in_specs=[
            pl.BlockSpec(memory_space=pl.ANY),                    # low feats stay in HBM
            pl.BlockSpec((9, Cp, Cp), lambda b, r: (0, 0, 0)),    # conv taps (resident)
            pl.BlockSpec((None, 1, Cp), lambda b, r: (b, 0, 0)),  # scale * gate
            pl.BlockSpec((None, 1, Cp), lambda b, r: (b, 0, 0)),  # shift * gate
        ],
        out_specs=pl.BlockSpec((None, L, Cp), lambda b, r: (b, r, 0)),
        scratch_shapes=[
            pltpu.VMEM((row_tile + 3, W2, Cp), low.dtype),        # padded row tile
            pltpu.SemaphoreType.DMA((3,)),                        # main / top / bottom
        ],
        compiler_params=pltpu.CompilerParams(
            dimension_semantics=("parallel", "parallel"),
            vmem_limit_bytes=48 * 1024 * 1024),
    )(low, w3_taps, scale_g, shift_g)

    # ---- one wrapper-side slice drops the junk pad columns and padded channels
    return out_flat.reshape(B, Hl, W2, Cp)[:, :, :Wl, :C]


def gau_reference(fms_high_nhwc, fms_low_nhwc, w1, w3, gamma, beta, rmean, rvar,
                  eps=1e-5):
    # Pure-JAX reference with identical semantics.
    gp = jnp.mean(fms_high_nhwc, axis=(1, 2))                 # (B, C_high)
    gate = jax.nn.relu(gp @ w1)                               # (B, C_low)
    conv = jax.lax.conv_general_dilated(
        fms_low_nhwc, w3, window_strides=(1, 1), padding="SAME",
        dimension_numbers=("NHWC", "HWIO", "NHWC"))
    scale = gamma / jnp.sqrt(rvar + eps)
    shift = beta - rmean * scale
    bn = conv * scale + shift
    return bn * gate[:, None, None, :]


if __name__ == "__main__":
    key = jax.random.PRNGKey(0)
    B, C_high, C_low = 2, 8, 4
    Hh = Wh = 8          # high-level (coarse) spatial
    Hl = Wl = 16         # low-level (fine) spatial

    ks = jax.random.split(key, 8)
    fms_high = jax.random.normal(ks[0], (B, Hh, Wh, C_high), jnp.float32)
    fms_low = jax.random.normal(ks[1], (B, Hl, Wl, C_low), jnp.float32)

    # Parameters (deterministic, synthetic). PyTorch conv weights are (O,I,kh,kw);
    # here we generate the equivalent (C_high,C_low) and HWIO (3,3,C_low,C_low).
    w1 = jax.random.normal(ks[2], (C_high, C_low), jnp.float32) * 0.1
    w3 = jax.random.normal(ks[3], (3, 3, C_low, C_low), jnp.float32) * 0.1
    gamma = 1.0 + 0.1 * jax.random.normal(ks[4], (C_low,), jnp.float32)
    beta = 0.1 * jax.random.normal(ks[5], (C_low,), jnp.float32)
    rmean = 0.1 * jax.random.normal(ks[6], (C_low,), jnp.float32)
    rvar = 1.0 + 0.1 * jnp.abs(jax.random.normal(ks[7], (C_low,), jnp.float32))

    ref = gau_reference(fms_high, fms_low, w1, w3, gamma, beta, rmean, rvar)

    # f32 operand path, explicit row tiling (exercises first/middle/last tiles)
    out = gau_forward(fms_high, fms_low, w1, w3, gamma, beta, rmean, rvar,
                      compute_dtype=jnp.float32, row_tile=4)
    out = jax.block_until_ready(out)
    assert out.shape == (B, Hl, Wl, C_low)
    assert out.dtype == fms_low.dtype
    assert jnp.allclose(out, ref, atol=1e-4, rtol=1e-4), "f32 mismatch vs reference"

    # default path: bf16 MXU operands (f32 accumulation + f32 tail), auto row tile
    out_bf16 = gau_forward(fms_high, fms_low, w1, w3, gamma, beta, rmean, rvar)
    out_bf16 = jax.block_until_ready(out_bf16)
    assert out_bf16.dtype == fms_low.dtype
    assert jnp.allclose(out_bf16.astype(jnp.float32), ref, atol=3e-2, rtol=5e-2), \
        "bf16 mismatch vs reference"

    print("KERNEL_OK")
</pallas_src>

<mosaic_0001>
module attributes {stable_mosaic.version = 11 : i64} {
  func.func @gau_kernel(%arg0: i32, %arg1: i32, %arg2: memref<2x16x16x128xf32, #tpu.memory_space<any>>, %arg3: memref<9x128x128xf32, #tpu.memory_space<vmem>>, %arg4: memref<1x1x128xf32, #tpu.memory_space<vmem>>, %arg5: memref<1x1x128xf32, #tpu.memory_space<vmem>>, %arg6: memref<1x96x128xf32, #tpu.memory_space<vmem>>, %arg7: memref<7x24x128xf32, #tpu.memory_space<vmem>>, %arg8: memref<3x!tpu.dma_semaphore, #tpu.memory_space<semaphore_mem>>) attributes {dimension_semantics = [#tpu.dimension_semantics<parallel>, #tpu.dimension_semantics<parallel>], iteration_bounds = array<i64: 2, 4>, scalar_prefetch = 0 : i64, scratch_operands = 2 : i64, tpu.core_type = #tpu.core_type<tc>, window_params = [{}, {pipeline_mode = #tpu.pipeline_mode<synchronous>, transform_indices = @transform_1, window_bounds = array<i64: 9, 128, 128>}, {transform_indices = @transform_2, window_bounds = array<i64: 1, 1, 128>}, {transform_indices = @transform_3, window_bounds = array<i64: 1, 1, 128>}, {transform_indices = @transform_4, window_bounds = array<i64: 1, 96, 128>}]} {
    %c4_i32 = arith.constant 4 : i32
    %0 = arith.muli %arg1, %c4_i32 : i32
    %c0_i32 = arith.constant 0 : i32
    %c0_i32_0 = arith.constant 0 : i32
    %c0_i32_1 = arith.constant 0 : i32
    %1 = tpu.memref_slice %arg2[%arg0, %0, %c0_i32_0, %c0_i32_1] : memref<2x16x16x128xf32, #tpu.memory_space<any>> -> memref<1x4x16x128xf32, #tpu.memory_space<any>>
    %2 = tpu.memref_squeeze %1 : memref<1x4x16x128xf32, #tpu.memory_space<any>> -> memref<4x16x128xf32, #tpu.memory_space<any>>
    %c1_i32 = arith.constant 1 : i32
    %c1_i32_2 = arith.constant 1 : i32
    %c0_i32_3 = arith.constant 0 : i32
    %3 = tpu.memref_slice %arg7[%c1_i32, %c1_i32_2, %c0_i32_3] : memref<7x24x128xf32, #tpu.memory_space<vmem>> -> memref<4x16x128xf32, #tpu.memory_space<vmem>>
    %4 = tpu.memref_slice %arg8[%c0_i32] : memref<3x!tpu.dma_semaphore, #tpu.memory_space<semaphore_mem>> -> memref<1x!tpu.dma_semaphore, #tpu.memory_space<semaphore_mem>>
    %5 = tpu.memref_squeeze %4 : memref<1x!tpu.dma_semaphore, #tpu.memory_space<semaphore_mem>> -> memref<!tpu.dma_semaphore, #tpu.memory_space<semaphore_mem>>
    tpu.enqueue_dma source(%2 : memref<4x16x128xf32, #tpu.memory_space<any>>) target(%3 : memref<4x16x128xf32, #tpu.memory_space<vmem>>) target_semaphore(%5 : memref<!tpu.dma_semaphore, #tpu.memory_space<semaphore_mem>>)
    %c0_i32_4 = arith.constant 0 : i32
    %6 = arith.cmpi sgt, %arg1, %c0_i32_4 : i32
    %7 = arith.extui %6 : i1 to i32
    %c0_i32_5 = arith.constant 0 : i32
    %8 = arith.cmpi ne, %7, %c0_i32_5 : i32
    scf.if %8 {
      %c1_i32_70 = arith.constant 1 : i32
      %92 = arith.subi %0, %c1_i32_70 : i32
      %c1_i32_71 = arith.constant 1 : i32
      %c0_i32_72 = arith.constant 0 : i32
      %c0_i32_73 = arith.constant 0 : i32
      %93 = tpu.memref_slice %arg2[%arg0, %92, %c0_i32_72, %c0_i32_73] : memref<2x16x16x128xf32, #tpu.memory_space<any>> -> memref<1x1x16x128xf32, #tpu.memory_space<any>>
      %94 = tpu.memref_squeeze %93 : memref<1x1x16x128xf32, #tpu.memory_space<any>> -> memref<1x16x128xf32, #tpu.memory_space<any>>
      %c0_i32_74 = arith.constant 0 : i32
      %c1_i32_75 = arith.constant 1 : i32
      %c0_i32_76 = arith.constant 0 : i32
      %95 = tpu.memref_slice %arg7[%c0_i32_74, %c1_i32_75, %c0_i32_76] : memref<7x24x128xf32, #tpu.memory_space<vmem>> -> memref<1x16x128xf32, #tpu.memory_space<vmem>>
      %96 = tpu.memref_slice %arg8[%c1_i32_71] : memref<3x!tpu.dma_semaphore, #tpu.memory_space<semaphore_mem>> -> memref<1x!tpu.dma_semaphore, #tpu.memory_space<semaphore_mem>>
      %97 = tpu.memref_squeeze %96 : memref<1x!tpu.dma_semaphore, #tpu.memory_space<semaphore_mem>> -> memref<!tpu.dma_semaphore, #tpu.memory_space<semaphore_mem>>
      tpu.enqueue_dma source(%94 : memref<1x16x128xf32, #tpu.memory_space<any>>) target(%95 : memref<1x16x128xf32, #tpu.memory_space<vmem>>) target_semaphore(%97 : memref<!tpu.dma_semaphore, #tpu.memory_space<semaphore_mem>>)
    } else {
    }
    %c3_i32 = arith.constant 3 : i32
    %9 = arith.cmpi slt, %arg1, %c3_i32 : i32
    %10 = arith.extui %9 : i1 to i32
    %c0_i32_6 = arith.constant 0 : i32
    %11 = arith.cmpi ne, %10, %c0_i32_6 : i32
    scf.if %11 {
      %c4_i32_70 = arith.constant 4 : i32
      %92 = arith.addi %0, %c4_i32_70 : i32
      %c2_i32 = arith.constant 2 : i32
      %c0_i32_71 = arith.constant 0 : i32
      %c0_i32_72 = arith.constant 0 : i32
      %93 = tpu.memref_slice %arg2[%arg0, %92, %c0_i32_71, %c0_i32_72] : memref<2x16x16x128xf32, #tpu.memory_space<any>> -> memref<1x1x16x128xf32, #tpu.memory_space<any>>
      %94 = tpu.memref_squeeze %93 : memref<1x1x16x128xf32, #tpu.memory_space<any>> -> memref<1x16x128xf32, #tpu.memory_space<any>>
      %c5_i32 = arith.constant 5 : i32
      %c1_i32_73 = arith.constant 1 : i32
      %c0_i32_74 = arith.constant 0 : i32
      %95 = tpu.memref_slice %arg7[%c5_i32, %c1_i32_73, %c0_i32_74] : memref<7x24x128xf32, #tpu.memory_space<vmem>> -> memref<1x16x128xf32, #tpu.memory_space<vmem>>
      %96 = tpu.memref_slice %arg8[%c2_i32] : memref<3x!tpu.dma_semaphore, #tpu.memory_space<semaphore_mem>> -> memref<1x!tpu.dma_semaphore, #tpu.memory_space<semaphore_mem>>
      %97 = tpu.memref_squeeze %96 : memref<1x!tpu.dma_semaphore, #tpu.memory_space<semaphore_mem>> -> memref<!tpu.dma_semaphore, #tpu.memory_space<semaphore_mem>>
      tpu.enqueue_dma source(%94 : memref<1x16x128xf32, #tpu.memory_space<any>>) target(%95 : memref<1x16x128xf32, #tpu.memory_space<vmem>>) target_semaphore(%97 : memref<!tpu.dma_semaphore, #tpu.memory_space<semaphore_mem>>)
    } else {
    }
    %cst = arith.constant 0.000000e+00 : f32
    %12 = vector.broadcast %cst : f32 to vector<1x24x128xf32>
    %cst_7 = arith.constant 0.000000e+00 : f32
    %13 = vector.broadcast %cst_7 : f32 to vector<7x1x128xf32>
    %c0 = arith.constant 0 : index
    %c0_8 = arith.constant 0 : index
    %c0_9 = arith.constant 0 : index
    %14 = vector.load %arg7[%c0, %c0_8, %c0_9] : memref<7x24x128xf32, #tpu.memory_space<vmem>>, vector<7x1x128xf32>
    tpu.vector_store %arg7[%c0, %c0_8, %c0_9], %13 {strides = array<i32>} : memref<7x24x128xf32, #tpu.memory_space<vmem>>, vector<7x1x128xf32>,
    %cst_10 = arith.constant 0.000000e+00 : f32
    %15 = vector.broadcast %cst_10 : f32 to vector<7x7x128xf32>
    %c0_11 = arith.constant 0 : index
    %c17 = arith.constant 17 : index
    %c0_12 = arith.constant 0 : index
    %16 = vector.load %arg7[%c0_11, %c17, %c0_12] : memref<7x24x128xf32, #tpu.memory_space<vmem>>, vector<7x7x128xf32>
    tpu.vector_store %arg7[%c0_11, %c17, %c0_12], %15 {strides = array<i32>} : memref<7x24x128xf32, #tpu.memory_space<vmem>>, vector<7x7x128xf32>,
    %c6 = arith.constant 6 : index
    %c0_13 = arith.constant 0 : index
    %c0_14 = arith.constant 0 : index
    %17 = vector.load %arg7[%c6, %c0_13, %c0_14] : memref<7x24x128xf32, #tpu.memory_space<vmem>>, vector<1x24x128xf32>
    tpu.vector_store %arg7[%c6, %c0_13, %c0_14], %12 {strides = array<i32>} : memref<7x24x128xf32, #tpu.memory_space<vmem>>, vector<1x24x128xf32>,
    %c0_i32_15 = arith.constant 0 : i32
    %18 = arith.cmpi eq, %arg1, %c0_i32_15 : i32
    %19 = arith.extui %18 : i1 to i32
    %c0_i32_16 = arith.constant 0 : i32
    %20 = arith.cmpi ne, %19, %c0_i32_16 : i32
    scf.if %20 {
      %c0_70 = arith.constant 0 : index
      %c0_71 = arith.constant 0 : index
      %c0_72 = arith.constant 0 : index
      %92 = vector.load %arg7[%c0_70, %c0_71, %c0_72] : memref<7x24x128xf32, #tpu.memory_space<vmem>>, vector<1x24x128xf32>
      tpu.vector_store %arg7[%c0_70, %c0_71, %c0_72], %12 {strides = array<i32>} : memref<7x24x128xf32, #tpu.memory_space<vmem>>, vector<1x24x128xf32>,
    } else {
    }
    %c3_i32_17 = arith.constant 3 : i32
    %21 = arith.cmpi eq, %arg1, %c3_i32_17 : i32
    %22 = arith.extui %21 : i1 to i32
    %c0_i32_18 = arith.constant 0 : i32
    %23 = arith.cmpi ne, %22, %c0_i32_18 : i32
    scf.if %23 {
      %c5_70 = arith.constant 5 : index
      %c0_71 = arith.constant 0 : index
      %c0_72 = arith.constant 0 : index
      %92 = vector.load %arg7[%c5_70, %c0_71, %c0_72] : memref<7x24x128xf32, #tpu.memory_space<vmem>>, vector<1x24x128xf32>
      tpu.vector_store %arg7[%c5_70, %c0_71, %c0_72], %12 {strides = array<i32>} : memref<7x24x128xf32, #tpu.memory_space<vmem>>, vector<1x24x128xf32>,
    } else {
    }
    %c0_i32_19 = arith.constant 0 : i32
    %c0_i32_20 = arith.constant 0 : i32
    %c0_i32_21 = arith.constant 0 : i32
    %24 = tpu.memref_slice %arg2[%arg0, %0, %c0_i32_20, %c0_i32_21] : memref<2x16x16x128xf32, #tpu.memory_space<any>> -> memref<1x4x16x128xf32, #tpu.memory_space<any>>
    %25 = tpu.memref_squeeze %24 : memref<1x4x16x128xf32, #tpu.memory_space<any>> -> memref<4x16x128xf32, #tpu.memory_space<any>>
    %c1_i32_22 = arith.constant 1 : i32
    %c1_i32_23 = arith.constant 1 : i32
    %c0_i32_24 = arith.constant 0 : i32
    %26 = tpu.memref_slice %arg7[%c1_i32_22, %c1_i32_23, %c0_i32_24] : memref<7x24x128xf32, #tpu.memory_space<vmem>> -> memref<4x16x128xf32, #tpu.memory_space<vmem>>
    %27 = tpu.memref_slice %arg8[%c0_i32_19] : memref<3x!tpu.dma_semaphore, #tpu.memory_space<semaphore_mem>> -> memref<1x!tpu.dma_semaphore, #tpu.memory_space<semaphore_mem>>
    %28 = tpu.memref_squeeze %27 : memref<1x!tpu.dma_semaphore, #tpu.memory_space<semaphore_mem>> -> memref<!tpu.dma_semaphore, #tpu.memory_space<semaphore_mem>>
    tpu.wait_dma2 semaphore(%28 : memref<!tpu.dma_semaphore, #tpu.memory_space<semaphore_mem>>) src(%25 : memref<4x16x128xf32, #tpu.memory_space<any>>) dst(%26 : memref<4x16x128xf32, #tpu.memory_space<vmem>>)
    %c0_i32_25 = arith.constant 0 : i32
    %29 = arith.cmpi sgt, %arg1, %c0_i32_25 : i32
    %30 = arith.extui %29 : i1 to i32
    %c0_i32_26 = arith.constant 0 : i32
    %31 = arith.cmpi ne, %30, %c0_i32_26 : i32
    scf.if %31 {
      %c1_i32_70 = arith.constant 1 : i32
      %92 = arith.subi %0, %c1_i32_70 : i32
      %c1_i32_71 = arith.constant 1 : i32
      %c0_i32_72 = arith.constant 0 : i32
      %c0_i32_73 = arith.constant 0 : i32
      %93 = tpu.memref_slice %arg2[%arg0, %92, %c0_i32_72, %c0_i32_73] : memref<2x16x16x128xf32, #tpu.memory_space<any>> -> memref<1x1x16x128xf32, #tpu.memory_space<any>>
      %94 = tpu.memref_squeeze %93 : memref<1x1x16x128xf32, #tpu.memory_space<any>> -> memref<1x16x128xf32, #tpu.memory_space<any>>
      %c0_i32_74 = arith.constant 0 : i32
      %c1_i32_75 = arith.constant 1 : i32
      %c0_i32_76 = arith.constant 0 : i32
      %95 = tpu.memref_slice %arg7[%c0_i32_74, %c1_i32_75, %c0_i32_76] : memref<7x24x128xf32, #tpu.memory_space<vmem>> -> memref<1x16x128xf32, #tpu.memory_space<vmem>>
      %96 = tpu.memref_slice %arg8[%c1_i32_71] : memref<3x!tpu.dma_semaphore, #tpu.memory_space<semaphore_mem>> -> memref<1x!tpu.dma_semaphore, #tpu.memory_space<semaphore_mem>>
      %97 = tpu.memref_squeeze %96 : memref<1x!tpu.dma_semaphore, #tpu.memory_space<semaphore_mem>> -> memref<!tpu.dma_semaphore, #tpu.memory_space<semaphore_mem>>
      tpu.wait_dma2 semaphore(%97 : memref<!tpu.dma_semaphore, #tpu.memory_space<semaphore_mem>>) src(%94 : memref<1x16x128xf32, #tpu.memory_space<any>>) dst(%95 : memref<1x16x128xf32, #tpu.memory_space<vmem>>)
    } else {
    }
    %c3_i32_27 = arith.constant 3 : i32
    %32 = arith.cmpi slt, %arg1, %c3_i32_27 : i32
    %33 = arith.extui %32 : i1 to i32
    %c0_i32_28 = arith.constant 0 : i32
    %34 = arith.cmpi ne, %33, %c0_i32_28 : i32
    scf.if %34 {
      %c4_i32_70 = arith.constant 4 : i32
      %92 = arith.addi %0, %c4_i32_70 : i32
      %c2_i32 = arith.constant 2 : i32
      %c0_i32_71 = arith.constant 0 : i32
      %c0_i32_72 = arith.constant 0 : i32
      %93 = tpu.memref_slice %arg2[%arg0, %92, %c0_i32_71, %c0_i32_72] : memref<2x16x16x128xf32, #tpu.memory_space<any>> -> memref<1x1x16x128xf32, #tpu.memory_space<any>>
      %94 = tpu.memref_squeeze %93 : memref<1x1x16x128xf32, #tpu.memory_space<any>> -> memref<1x16x128xf32, #tpu.memory_space<any>>
      %c5_i32 = arith.constant 5 : i32
      %c1_i32_73 = arith.constant 1 : i32
      %c0_i32_74 = arith.constant 0 : i32
      %95 = tpu.memref_slice %arg7[%c5_i32, %c1_i32_73, %c0_i32_74] : memref<7x24x128xf32, #tpu.memory_space<vmem>> -> memref<1x16x128xf32, #tpu.memory_space<vmem>>
      %96 = tpu.memref_slice %arg8[%c2_i32] : memref<3x!tpu.dma_semaphore, #tpu.memory_space<semaphore_mem>> -> memref<1x!tpu.dma_semaphore, #tpu.memory_space<semaphore_mem>>
      %97 = tpu.memref_squeeze %96 : memref<1x!tpu.dma_semaphore, #tpu.memory_space<semaphore_mem>> -> memref<!tpu.dma_semaphore, #tpu.memory_space<semaphore_mem>>
      tpu.wait_dma2 semaphore(%97 : memref<!tpu.dma_semaphore, #tpu.memory_space<semaphore_mem>>) src(%94 : memref<1x16x128xf32, #tpu.memory_space<any>>) dst(%95 : memref<1x16x128xf32, #tpu.memory_space<vmem>>)
    } else {
    }
    %c0_29 = arith.constant 0 : index
    %c0_30 = arith.constant 0 : index
    %c0_31 = arith.constant 0 : index
    %35 = vector.load %arg7[%c0_29, %c0_30, %c0_31] : memref<7x24x128xf32, #tpu.memory_space<vmem>>, vector<7x24x128xf32>
    %36 = vector.shape_cast %35 : vector<7x24x128xf32> to vector<168x128xf32>
    %37 = vector.extract_strided_slice %36 {offsets = [0, 0], sizes = [96, 128], strides = [1, 1]} : vector<168x128xf32> to vector<96x128xf32>
    %c0_32 = arith.constant 0 : index
    %c0_33 = arith.constant 0 : index
    %c0_34 = arith.constant 0 : index
    %38 = vector.load %arg3[%c0_32, %c0_33, %c0_34] : memref<9x128x128xf32, #tpu.memory_space<vmem>>, vector<1x128x128xf32>
    %39 = vector.shape_cast %38 : vector<1x128x128xf32> to vector<128x128xf32>
    %cst_35 = arith.constant dense<0.000000e+00> : vector<96x128xf32>
    %40 = tpu.matmul %37, %39, %cst_35 {dimension_numbers = #tpu.dot_dimension_numbers<[1], [0], [0], [1], [0, 0, 1, 1], [], []>} : vector<96x128xf32>, vector<128x128xf32>, vector<96x128xf32> -> vector<96x128xf32>
    %41 = vector.extract_strided_slice %36 {offsets = [1, 0], sizes = [96, 128], strides = [1, 1]} : vector<168x128xf32> to vector<96x128xf32>
    %c1 = arith.constant 1 : index
    %c0_36 = arith.constant 0 : index
    %c0_37 = arith.constant 0 : index
    %42 = vector.load %arg3[%c1, %c0_36, %c0_37] : memref<9x128x128xf32, #tpu.memory_space<vmem>>, vector<1x128x128xf32>
    %43 = vector.shape_cast %42 : vector<1x128x128xf32> to vector<128x128xf32>
    %cst_38 = arith.constant dense<0.000000e+00> : vector<96x128xf32>
    %44 = tpu.matmul %41, %43, %cst_38 {dimension_numbers = #tpu.dot_dimension_numbers<[1], [0], [0], [1], [0, 0, 1, 1], [], []>} : vector<96x128xf32>, vector<128x128xf32>, vector<96x128xf32> -> vector<96x128xf32>
    %45 = arith.addf %40, %44 : vector<96x128xf32>
    %46 = vector.extract_strided_slice %36 {offsets = [2, 0], sizes = [96, 128], strides = [1, 1]} : vector<168x128xf32> to vector<96x128xf32>
    %c2 = arith.constant 2 : index
    %c0_39 = arith.constant 0 : index
    %c0_40 = arith.constant 0 : index
    %47 = vector.load %arg3[%c2, %c0_39, %c0_40] : memref<9x128x128xf32, #tpu.memory_space<vmem>>, vector<1x128x128xf32>
    %48 = vector.shape_cast %47 : vector<1x128x128xf32> to vector<128x128xf32>
    %cst_41 = arith.constant dense<0.000000e+00> : vector<96x128xf32>
    %49 = tpu.matmul %46, %48, %cst_41 {dimension_numbers = #tpu.dot_dimension_numbers<[1], [0], [0], [1], [0, 0, 1, 1], [], []>} : vector<96x128xf32>, vector<128x128xf32>, vector<96x128xf32> -> vector<96x128xf32>
    %50 = arith.addf %45, %49 : vector<96x128xf32>
    %51 = vector.extract_strided_slice %36 {offsets = [24, 0], sizes = [96, 128], strides = [1, 1]} : vector<168x128xf32> to vector<96x128xf32>
    %c3 = arith.constant 3 : index
    %c0_42 = arith.constant 0 : index
    %c0_43 = arith.constant 0 : index
    %52 = vector.load %arg3[%c3, %c0_42, %c0_43] : memref<9x128x128xf32, #tpu.memory_space<vmem>>, vector<1x128x128xf32>
    %53 = vector.shape_cast %52 : vector<1x128x128xf32> to vector<128x128xf32>
    %cst_44 = arith.constant dense<0.000000e+00> : vector<96x128xf32>
    %54 = tpu.matmul %51, %53, %cst_44 {dimension_numbers = #tpu.dot_dimension_numbers<[1], [0], [0], [1], [0, 0, 1, 1], [], []>} : vector<96x128xf32>, vector<128x128xf32>, vector<96x128xf32> -> vector<96x128xf32>
    %55 = arith.addf %50, %54 : vector<96x128xf32>
    %56 = vector.extract_strided_slice %36 {offsets = [25, 0], sizes = [96, 128], strides = [1, 1]} : vector<168x128xf32> to vector<96x128xf32>
    %c4 = arith.constant 4 : index
    %c0_45 = arith.constant 0 : index
    %c0_46 = arith.constant 0 : index
    %57 = vector.load %arg3[%c4, %c0_45, %c0_46] : memref<9x128x128xf32, #tpu.memory_space<vmem>>, vector<1x128x128xf32>
    %58 = vector.shape_cast %57 : vector<1x128x128xf32> to vector<128x128xf32>
    %cst_47 = arith.constant dense<0.000000e+00> : vector<96x128xf32>
    %59 = tpu.matmul %56, %58, %cst_47 {dimension_numbers = #tpu.dot_dimension_numbers<[1], [0], [0], [1], [0, 0, 1, 1], [], []>} : vector<96x128xf32>, vector<128x128xf32>, vector<96x128xf32> -> vector<96x128xf32>
    %60 = arith.addf %55, %59 : vector<96x128xf32>
    %61 = vector.extract_strided_slice %36 {offsets = [26, 0], sizes = [96, 128], strides = [1, 1]} : vector<168x128xf32> to vector<96x128xf32>
    %c5 = arith.constant 5 : index
    %c0_48 = arith.constant 0 : index
    %c0_49 = arith.constant 0 : index
    %62 = vector.load %arg3[%c5, %c0_48, %c0_49] : memref<9x128x128xf32, #tpu.memory_space<vmem>>, vector<1x128x128xf32>
    %63 = vector.shape_cast %62 : vector<1x128x128xf32> to vector<128x128xf32>
    %cst_50 = arith.constant dense<0.000000e+00> : vector<96x128xf32>
    %64 = tpu.matmul %61, %63, %cst_50 {dimension_numbers = #tpu.dot_dimension_numbers<[1], [0], [0], [1], [0, 0, 1, 1], [], []>} : vector<96x128xf32>, vector<128x128xf32>, vector<96x128xf32> -> vector<96x128xf32>
    %65 = arith.addf %60, %64 : vector<96x128xf32>
    %66 = vector.extract_strided_slice %36 {offsets = [48, 0], sizes = [96, 128], strides = [1, 1]} : vector<168x128xf32> to vector<96x128xf32>
    %c6_51 = arith.constant 6 : index
    %c0_52 = arith.constant 0 : index
    %c0_53 = arith.constant 0 : index
    %67 = vector.load %arg3[%c6_51, %c0_52, %c0_53] : memref<9x128x128xf32, #tpu.memory_space<vmem>>, vector<1x128x128xf32>
    %68 = vector.shape_cast %67 : vector<1x128x128xf32> to vector<128x128xf32>
    %cst_54 = arith.constant dense<0.000000e+00> : vector<96x128xf32>
    %69 = tpu.matmul %66, %68, %cst_54 {dimension_numbers = #tpu.dot_dimension_numbers<[1], [0], [0], [1], [0, 0, 1, 1], [], []>} : vector<96x128xf32>, vector<128x128xf32>, vector<96x128xf32> -> vector<96x128xf32>
    %70 = arith.addf %65, %69 : vector<96x128xf32>
    %71 = vector.extract_strided_slice %36 {offsets = [49, 0], sizes = [96, 128], strides = [1, 1]} : vector<168x128xf32> to vector<96x128xf32>
    %c7 = arith.constant 7 : index
    %c0_55 = arith.constant 0 : index
    %c0_56 = arith.constant 0 : index
    %72 = vector.load %arg3[%c7, %c0_55, %c0_56] : memref<9x128x128xf32, #tpu.memory_space<vmem>>, vector<1x128x128xf32>
    %73 = vector.shape_cast %72 : vector<1x128x128xf32> to vector<128x128xf32>
    %cst_57 = arith.constant dense<0.000000e+00> : vector<96x128xf32>
    %74 = tpu.matmul %71, %73, %cst_57 {dimension_numbers = #tpu.dot_dimension_numbers<[1], [0], [0], [1], [0, 0, 1, 1], [], []>} : vector<96x128xf32>, vector<128x128xf32>, vector<96x128xf32> -> vector<96x128xf32>
    %75 = arith.addf %70, %74 : vector<96x128xf32>
    %76 = vector.extract_strided_slice %36 {offsets = [50, 0], sizes = [96, 128], strides = [1, 1]} : vector<168x128xf32> to vector<96x128xf32>
    %c8 = arith.constant 8 : index
    %c0_58 = arith.constant 0 : index
    %c0_59 = arith.constant 0 : index
    %77 = vector.load %arg3[%c8, %c0_58, %c0_59] : memref<9x128x128xf32, #tpu.memory_space<vmem>>, vector<1x128x128xf32>
    %78 = vector.shape_cast %77 : vector<1x128x128xf32> to vector<128x128xf32>
    %cst_60 = arith.constant dense<0.000000e+00> : vector<96x128xf32>
    %79 = tpu.matmul %76, %78, %cst_60 {dimension_numbers = #tpu.dot_dimension_numbers<[1], [0], [0], [1], [0, 0, 1, 1], [], []>} : vector<96x128xf32>, vector<128x128xf32>, vector<96x128xf32> -> vector<96x128xf32>
    %80 = arith.addf %75, %79 : vector<96x128xf32>
    %c0_61 = arith.constant 0 : index
    %c0_62 = arith.constant 0 : index
    %c0_63 = arith.constant 0 : index
    %81 = vector.load %arg4[%c0_61, %c0_62, %c0_63] : memref<1x1x128xf32, #tpu.memory_space<vmem>>, vector<1x1x128xf32>
    %82 = vector.shape_cast %81 : vector<1x1x128xf32> to vector<1x128xf32>
    %83 = vector.broadcast %82 : vector<1x128xf32> to vector<96x128xf32>
    %84 = arith.mulf %80, %83 : vector<96x128xf32>
    %c0_64 = arith.constant 0 : index
    %c0_65 = arith.constant 0 : index
    %c0_66 = arith.constant 0 : index
    %85 = vector.load %arg5[%c0_64, %c0_65, %c0_66] : memref<1x1x128xf32, #tpu.memory_space<vmem>>, vector<1x1x128xf32>
    %86 = vector.shape_cast %85 : vector<1x1x128xf32> to vector<1x128xf32>
    %87 = vector.broadcast %86 : vector<1x128xf32> to vector<96x128xf32>
    %88 = arith.addf %84, %87 : vector<96x128xf32>
    %c0_67 = arith.constant 0 : index
    %c0_68 = arith.constant 0 : index
    %c0_69 = arith.constant 0 : index
    %89 = vector.load %arg6[%c0_67, %c0_68, %c0_69] : memref<1x96x128xf32, #tpu.memory_space<vmem>>, vector<1x96x128xf32>
    %90 = vector.shape_cast %89 : vector<1x96x128xf32> to vector<96x128xf32>
    %91 = vector.shape_cast %88 : vector<96x128xf32> to vector<1x96x128xf32>
    tpu.vector_store %arg6[%c0_67, %c0_68, %c0_69], %91 {strides = array<i32>} : memref<1x96x128xf32, #tpu.memory_space<vmem>>, vector<1x96x128xf32>,
    return
  }
  func.func @transform_1(%arg0: i32, %arg1: i32) -> (i32, i32, i32) {
    %c0_i32 = arith.constant 0 : i32
    %c0_i32_0 = arith.constant 0 : i32
    %c0_i32_1 = arith.constant 0 : i32
    %c0_i32_2 = arith.constant 0 : i32
    return %c0_i32, %c0_i32_0, %c0_i32_1 : i32, i32, i32
  }
  func.func @transform_2(%arg0: i32, %arg1: i32) -> (i32, i32, i32) {
    %c0_i32 = arith.constant 0 : i32
    %c0_i32_0 = arith.constant 0 : i32
    %c0_i32_1 = arith.constant 0 : i32
    return %arg0, %c0_i32, %c0_i32_0 : i32, i32, i32
  }
  func.func @transform_3(%arg0: i32, %arg1: i32) -> (i32, i32, i32) {
    %c0_i32 = arith.constant 0 : i32
    %c0_i32_0 = arith.constant 0 : i32
    %c0_i32_1 = arith.constant 0 : i32
    return %arg0, %c0_i32, %c0_i32_0 : i32, i32, i32
  }
  func.func @transform_4(%arg0: i32, %arg1: i32) -> (i32, i32, i32) {
    %c0_i32 = arith.constant 0 : i32
    %c0_i32_0 = arith.constant 0 : i32
    return %arg0, %arg1, %c0_i32 : i32, i32, i32
  }
}

</mosaic_0001>

<bundles_post_ra>
// kernel: tpu_custom_call.1
= control target key start
LH: loop header
LB: loop body
LE: loop exit
PB: predicated region body
PF: predicated region fallthrough
CT: control target
= control target key end

     0   :  { %s2613_s0 = inlined_call_operand.hbm [shape: f32[2,16,16,128], index: 0, kind: input, shape index: {}]   ;;  %s2614_s1 = inlined_call_operand.hbm [shape: f32[9,128,128], index: 1, kind: input, shape index: {}]   ;;  %s2615_s2 = inlined_call_operand.hbm [shape: f32[2,1,128], index: 2, kind: input, shape index: {}]   ;;  %s2616_s3 = inlined_call_operand.vmem [shape: f32[2,1,128], index: 3, kind: input, shape index: {}]   ;;  %s2617_s4 = inlined_call_operand.hbm [shape: f32[2,384,128], index: 4, kind: output, shape index: {}]  }
   0x1   :  { %2629 = sst [smem:[#allocation34_spill]] %s2614_s1 }
   0x2   :  { %2630 = sst [smem:[#allocation35_spill]] %s2615_s2 }
   0x3   :  { %9 = vsyncpa [#allocation5], 0 }
   0x4   :  { %10 = vsyncpa [#allocation8], 0 }
   0x5   :  { %12 = vsyncpa [#allocation8 + $0x1], 0 }
   0x6   :  { %13 = vsyncpa [#allocation6], 0 }
   0x7   :  { %15 = vsyncpa [#allocation6 + $0x1], 0  ;;  %s1943_s15 = smov 0   ;;  %s1945_s16 = smov 0  }
   0x8   :  { %s1947_s17 = smov 0   ;;  %s1949_s18 = smov 0  }
   0x9   :  { %s1951_s19 = smov 0   ;;  %s1953_s20 = smov 0  }
   0xa   :  { %s1955_s21 = smov 0   ;;  %s1957_s22 = smov 0  }
   0xb   :  { %s1959_s23 = smov 0   ;;  %s1961_s24 = smov 0  }
   0xc   :  { %s1963_s25 = smov 0  }
   0xd LB: > { %2631 = sst [smem:[#allocation23_spill]] %s1862_s15  ;;  %s1407_s26 = sadd.s32 4294967295, %s1902_s25   ;;  %s1902_s25 = sphi %s1963_s25, %s21_s25   ;;  %s1898_s24 = sphi %s1961_s24, %s2664_s24   ;;  %s1894_s23 = sphi %s1959_s23, %s2663_s23   ;;  %s1890_s22 = sphi %s1957_s22, %s2662_s22   ;;  %s1886_s21 = sphi %s1955_s21, %s2661_s21   ;;  %s1882_s20 = sphi %s1953_s20, %s2660_s20   ;;  %s1878_s19 = sphi %s1951_s19, %s2659_s19   ;;  %s1874_s18 = sphi %s1949_s18, %s2658_s18   ;;  %s1870_s17 = sphi %s1947_s17, %s2657_s17   ;;  %s1866_s16 = sphi %s1945_s16, %s2666_s16   ;;  %s1862_s15 = sphi %s1943_s15, %s2665_s15  }
   0xe   : > { %2632 = sst [smem:[#allocation24_spill]] %s1870_s17  ;;  %p1409_p0 = scmp.ge.s32.totalorder %s1902_s25, 1 }
   0xf   : > { %2633 = sst [smem:[#allocation25_spill]] %s1878_s19  ;;  %p2000_p1 = scmp.eq.s32.totalorder %s1407_s26, 0 }
  0x10   : > { %2634 = sst [smem:[#allocation26_spill]] %s1882_s20  ;;  %p2004_p2 = scmp.eq.s32.totalorder %s1407_s26, 7 }
  0x11   : > { %2635 = sst [smem:[#allocation27_spill]] %s1894_s23  ;;  %p139_p3 = scmp.lt.s32.totalorder %s1902_s25, 9 }
  0x12   : > { %2636 = sst [smem:[#allocation28_spill]] %s1898_s24  ;;  %s1904_s7 = smov [#allocation4]  }
  0x13   : > { %s2639_s1 = sld [smem:[#allocation34_spill]]  ;;  %p2012_p4 = pnand %p1409_p0, %p139_p3 }
  0x14   : > { %s152_s8 = sshll.u32 %s1904_s7, 4  ;;  %s1905_s9 = smov 128   ;;  %s153_s8 = int_to_ptr.vmem [resolvable:$true] %s152_s8 }
  0x15   : > { %p1502_p5 = pneg %p2012_p4  ;;  %s1906_s10 = smov 8  }
  0x16   : > { %s1408_s11 = sadd.s32 4294967294, %s1902_s25   ;;  %s30_s12 = sadd.s32 1, %s1894_s23 }
  0x17   : > { %p1503_p6 = pnand %p1502_p5, %p2000_p1  ;;  %p31_p7 = scmp.ge.s32.totalorder %s30_s12, 4 }
  0x18   : > { %s33_s13 = sadd.s32 1, %s1898_s24  ;;  %s61_s14 = sadd.s32 1, %s1882_s20 }
  0x19   : > { %s150_s5 = sshll.u32 %s2639_s1, 4  ;;  %p68_p8 = scmp.ne.s32.totalorder %s1882_s20, %s1878_s19  ;;  %s151_s5 = int_to_ptr.hbm [resolvable:$true] %s150_s5 }
  0x1a   : > { %1505 = dma.hbm_to_vmem [thread:$0]  (!%p1503_p6), %s151_s5, 18432, %s153_s8, [#allocation5], %s1905_s9, %s1905_s9, %s1906_s10  }
  0x1b   : > { %s2668_s12 = smov (%p31_p7, %s30_s12), 0  ;;  %s2670_s13 = smov (!%p31_p7, %s33_s13), %s1898_s24 }
  0x1c   : > { %2641 = sst [smem:[#allocation29_spill]] %s2668_s12  ;;  %p69_p9 = scmp.eq.s32.totalorder %s1902_s25, 0 }
  0x1d   : > { %p74_p10 = scmp.ne.s32.totalorder %s1878_s19, %s1874_s18  ;;  %p35_p11 = scmp.ge.s32.totalorder %s2670_s13, 2 }
  0x1e   : > { %s111_s26 = ssub.s32 %s1894_s23, %s2668_s12  ;;  %p2034_p12 = por %p69_p9, %p68_p8 }
  0x1f   : > { %p2040_p13 = por %p2000_p1, %p74_p10  ;;  %s2672_s13 = smov (%p35_p11, %s2670_s13), 0 }
  0x20   : > { %2644 = sst [smem:[#allocation30_spill]] %s2672_s13  ;;  %s115_s5 = sadd.s32 1, %s1870_s17 }
  0x21   : > { %p125_p0 = scmp.ne.s32.totalorder %s1870_s17, %s1866_s16  ;;  %s58_s18 = ssub.s32 %s1898_s24, %s2672_s13 }
  0x22   : > { %p131_p3 = scmp.ne.s32.totalorder %s1866_s16, %s1862_s15  ;;  %p59_p5 = scmp.eq.s32.totalorder %s58_s18, 0 }
  0x23   : > { %s112_s7 = sor.u32 %s111_s26, %s58_s18  ;;  %p2055_p7 = por %p2004_p2, %p125_p0 }
  0x24   : > { %p113_p6 = scmp.eq.s32.totalorder %s112_s7, 0  ;;  %p132_p8 = scmp.eq.s32.totalorder %s1408_s11, 7 }
  0x25   : > { %s2060_s9 = scalar_select %p59_p5, %s1882_s20, %s61_s14  }
  0x26   : > { %s2063_s10 = scalar_select %p113_p6, %s1870_s17, %s115_s5  }
  0x27   : > { %2646 = sst [smem:[#allocation31_spill]] %s2060_s9  ;;  %p1515_p9 = scmp.lt.s32.totalorder %s1902_s25, 8 }
  0x28   : > { %2647 = sst [smem:[#allocation32_spill]] %s2063_s10  ;;  %s166_s1 = sand.u32 1, %s1882_s20  }
  0x29   : > { %s2648_s2 = sld [smem:[#allocation35_spill]]  ;;  %p2071_p10 = por %p132_p8, %p131_p3 }
  0x2a   : > { %s169_s26 = scalar_lea.vmem [#allocation7], %s166_s1  ;;  %p1507_p2 = pnand %p1515_p9, %p2034_p12 }
  0x2b   : > { %s2649_s15 = scalar_select %p2071_p10, 1, 0 }
  0x2c   : > { %s176_s18 = sshll.u32 %s169_s26, 4  ;;  %s167_s14 = scalar_lea.sflag [#allocation8], %s166_s1  ;;  %s177_s18 = int_to_ptr.vmem [resolvable:$true] %s176_s18 }
  0x2d   : > { %2650 = sst [smem:[#allocation33_spill]] %s2649_s15  ;;  %191 = sbr.rel (%p2012_p4) target bundleno = 533 (0x215), region = 32 }
  0x2f   : > { %s172_s13 = scalar_lea.hbm %s2648_s2, %s1898_s24 }
  0x30   : > { %s174_s28 = sshll.u32 %s172_s13, 4  ;;  %s175_s28 = int_to_ptr.hbm [resolvable:$true] %s174_s28 }
  0x31   : > { %1509 = dma.hbm_to_vmem [thread:$0]  (!%p1507_p2), %s175_s28, 16, %s177_s18, %s167_s14  }
  0x32   : > { %1839 = dma.done.wait (%p2000_p1), [#allocation5], 18432  }
  0x33   : > { %1841 = vsyncadd (%p2000_p1), [#allocation5], 4294948864  ;;  %s198_s23 = sand.u32 1, %s1878_s19  }
  0x34   : > { %s199_s11 = scalar_lea.sflag [#allocation8], %s198_s23  ;;  %s2084_s12 = scalar_lea.vmem [#allocation7], %s198_s23 }
  0x35   : > { %1843 = dma.done.wait (%p2040_p13), %s199_s11, 16  }
  0x36   : > { %1845 = vsyncadd (%p2040_p13), %s199_s11, 4294967280  ;;  %s2622_s1 = sand.u32 1, %s1866_s16   ;;  %p227_p1 = scmp.lt.s32.totalorder %s1890_s22, 1 }
  0x37   : > { %s2094_s27 = smul.u32 96, %s2622_s1  ;;  %s1434_s6 = sshll.u32 %s1886_s21, 6 }
  0x38   : > { %s2098_s13 = scalar_select %p227_p1, %s1890_s22, 1 }
  0x39   : > { %s2624_s29 = sshll.u32 %s1890_s22, 8  ;;  %s1907_s11 = smov [#allocation2 + $0x19]  }
  0x3a   : > { %s234_s28 = sadd.s32 %s1434_s6, %s2624_s29  ;;  %s239_s1 = sshll.u32 %s1907_s11, 4  ;;  %s240_s1 = int_to_ptr.vmem [resolvable:$true] %s239_s1 }
  0x3b   : > { %s2110_s14 = scalar_lea.hbm %s2613_s0, %s234_s28  ;;  %s1414_s2 = sshll.u32 %s1886_s21, 2 }
  0x3c   : > { %s237_s23 = sshll.u32 %s2110_s14, 4  ;;  %s2117_s6 = scalar_lea.hbm %s2613_s0, 512  ;;  %s238_s23 = int_to_ptr.hbm [resolvable:$true] %s237_s23 }
  0x3d   : > { %s1686_s24 = sshra.s32 %s238_s23, 4  ;;  %s1687_s24 = int_to_ptr.hbm [resolvable:$true] %s1686_s24 }
  0x3e   : > { %s1688_s9 = scalar_lea.hbm %s1687_s24, 64  ;;  %p1691_p11 = scmp.lt.s32.totalorder %s1687_s24, %s2613_s0 }
  0x3f   : > { %p1689_p4 = scmp.ne.s32.totalorder %s1687_s24, %s1688_s9  ;;  %p1692_p12 = scmp.lt.s32.totalorder %s2117_s6, %s1688_s9 }
  0x41   : > { %p1693_p13 = por %p1692_p12, %p1691_p11 }
  0x43   : > { %p1694_p0 = pnand %p1693_p13, %p1689_p4 }
  0x45   : > { %1697 = shalt.err (!%p1694_p0)  }
  0x46   : > { %s1908_s28 = smov 256   ;;  %s1909_s18 = smov 384  }
  0x47   : > { %s1910_s11 = smov 16   ;;  %p1517_p3 = scmp.gt.s32.totalorder %s1886_s21, 0 }
  0x48   : > { %244 = dma.hbm_to_vmem [thread:$0]  %s238_s23, 1024, %s240_s1, [#allocation3], %s1908_s28, %s1909_s18, %s1910_s11 }
  0x49   : > { %s1418_s30 = sadd.s32 4294967295, %s1414_s2  ;;  %s1911_s29 = smov [#allocation2 + $0x1]  }
  0x4a   : > { %s1419_s5 = sshll.u32 %s1418_s30, 4  ;;  %s264_s7 = sshll.u32 %s1911_s29, 4  ;;  %s265_s7 = int_to_ptr.vmem [resolvable:$true] %s264_s7 }
  0x4b   : > { %s2651_s24 = sshll.u32 %s1890_s22, 8  ;;  %p1518_p5 = scmp.lt.s32.totalorder %s1886_s21, 3 }
  0x4c   : > { %s251_s9 = sadd.s32 %s1419_s5, %s2651_s24  ;;  %s1345_s17 = scalar_lea.hbm %s2110_s14, 64 }
  0x4d   : > { %s252_s19 = scalar_lea.hbm %s2613_s0, %s251_s9 }
  0x4e   : > { %s262_s10 = sshll.u32 %s252_s19, 4  ;;  %s263_s10 = int_to_ptr.hbm [resolvable:$true] %s262_s10 }
  0x4f   : > { %s1710_s15 = sshra.s32 %s263_s10, 4  ;;  %s1711_s15 = int_to_ptr.hbm [resolvable:$true] %s1710_s15 }
  0x50   : > { %s1712_s1 = scalar_lea.hbm %s1711_s15, 16  ;;  %p1717_p2 = scmp.lt.s32.totalorder %s1711_s15, %s2613_s0 }
  0x51   : > { %p1713_p6 = scmp.ne.s32.totalorder %s1711_s15, %s1712_s1  ;;  %p1718_p1 = scmp.lt.s32.totalorder %s2117_s6, %s1712_s1 }
  0x53   : > { %p1714_p8 = pnand %p1713_p6, %p1517_p3  ;;  %p1719_p4 = por %p1718_p1, %p1717_p2 }
  0x55   : > { %p1715_p9 = pneg %p1714_p8 }
  0x57   : > { %p1720_p11 = pnand %p1719_p4, %p1715_p9 }
  0x59   : > { %1723 = shalt.err (!%p1720_p11)  }
  0x5a   : > { %1493 = dma.hbm_to_vmem [thread:$0]  (%p1517_p3), %s263_s10, 256, %s265_s7, [#allocation3 + $0x1] }
  0x5b   : > { %s285_s19 = sshll.u32 %s1345_s17, 4  ;;  %s1912_s20 = smov [#allocation2 + $0x79]   ;;  %s286_s19 = int_to_ptr.hbm [resolvable:$true] %s285_s19 }
  0x5c   : > { %s287_s14 = sshll.u32 %s1912_s20, 4  ;;  %s1738_s23 = sshra.s32 %s286_s19, 4  ;;  %s288_s14 = int_to_ptr.vmem [resolvable:$true] %s287_s14  ;;  %s1739_s23 = int_to_ptr.hbm [resolvable:$true] %s1738_s23 }
  0x5d   : > { %s1740_s28 = scalar_lea.hbm %s1739_s23, 16  ;;  %p1745_p6 = scmp.lt.s32.totalorder %s1739_s23, %s2613_s0 }
  0x5e   : > { %p1741_p12 = scmp.ne.s32.totalorder %s1739_s23, %s1740_s28  ;;  %p1746_p8 = scmp.lt.s32.totalorder %s2117_s6, %s1740_s28 }
  0x60   : > { %p1742_p13 = pnand %p1741_p12, %p1518_p5  ;;  %p1747_p9 = por %p1746_p8, %p1745_p6 }
  0x62   : > { %p1743_p0 = pneg %p1742_p13 }
  0x64   : > { %p1748_p2 = pnand %p1747_p9, %p1743_p0 }
  0x66   : > { %1751 = shalt.err (!%p1748_p2)  }
  0x67   : > { %1495 = dma.hbm_to_vmem [thread:$0]  (%p1518_p5), %s286_s19, 256, %s288_s14, [#allocation3 + $0x2]  ;;  %v1913_v0 = vmov 0.0  }
  0x68   : > { %297 = vst [vmem:[#allocation2 + $0x90] sm:$0x1] %v1913_v0  ;;  %s2148_s17 = scalar_lea.vmem [#allocation9], %s2094_s27  ;;  %p1424_p1 = scmp.ne.s32.totalorder %s1886_s21, 0 }
  0x69   : > { %291 = vst [vmem:[#allocation2] sm:$0x1] %v1913_v0 }
  0x6a   : > { %292 = vst [vmem:[#allocation2 + $0x18] sm:$0x1] %v1913_v0 }
  0x6b   : > { %293 = vst [vmem:[#allocation2 + $0x30] sm:$0x1] %v1913_v0 }
  0x6c   : > { %294 = vst [vmem:[#allocation2 + $0x48] sm:$0x1] %v1913_v0 }
  0x6d   : > { %295 = vst [vmem:[#allocation2 + $0x60] sm:$0x1] %v1913_v0 }
  0x6e   : > { %296 = vst [vmem:[#allocation2 + $0x78] sm:$0x1] %v1913_v0 }
  0x6f   : > { %298 = vst [vmem:[#allocation2 + $0x11] sm:$0x7f] %v1913_v0 }
  0x70   : > { %299 = vst [vmem:[#allocation2 + $0x29] sm:$0x7f] %v1913_v0 }
  0x71   : > { %300 = vst [vmem:[#allocation2 + $0x41] sm:$0x7f] %v1913_v0  ;;  %312 = sbr.rel (%p1424_p1) target bundleno = 122 (0x7a), region = 60 }
  0x72   : > { %301 = vst [vmem:[#allocation2 + $0x59] sm:$0x7f] %v1913_v0 }
  0x73   : > { %302 = vst [vmem:[#allocation2 + $0x71] sm:$0x7f] %v1913_v0 }
  0x74   : > { %303 = vst [vmem:[#allocation2 + $0x89] sm:$0x7f] %v1913_v0 }
  0x75   : > { %306 = vst [vmem:[#allocation2 + $0x90] sm:$0xff] %v1913_v0 }
  0x76   : > { %v1914_v1 = vmov 0.0  }
  0x77   : > { %313 = vst [vmem:[#allocation2] sm:$0xff] %v1914_v1 }
  0x78   : > { %314 = vst [vmem:[#allocation2 + $0x8] sm:$0xff] %v1914_v1 }
  0x79   : > { %315 = vst [vmem:[#allocation2 + $0x10] sm:$0xff] %v1914_v1 }
  0x7a PF: > { %p1425_p4 = scmp.ne.s32.totalorder %s1886_s21, 3 }
  0x7c   : > { %319 = sbr.rel (%p1425_p4) target bundleno = 133 (0x85), region = 64 }
  0x81   : > { %v1915_v2 = vmov 0.0  }
  0x82   : > { %321 = vst [vmem:[#allocation2 + $0x78] sm:$0xff] %v1915_v2 }
  0x83   : > { %322 = vst [vmem:[#allocation2 + $0x80] sm:$0xff] %v1915_v2 }
  0x84   : > { %323 = vst [vmem:[#allocation2 + $0x88] sm:$0xff] %v1915_v2 }
  0x85 PF: > { %1846 = dma.done.wait [#allocation3], 1024 }
  0x86   : > { %1847 = vsyncadd [#allocation3], 4294966272 }
  0x87   : > { %1849 = dma.done.wait (%p1517_p3), [#allocation3 + $0x1], 256 }
  0x88   : > { %1851 = vsyncadd (%p1517_p3), [#allocation3 + $0x1], 4294967040 }
  0x89   : > { %1853 = dma.done.wait (%p1518_p5), [#allocation3 + $0x2], 256 }
  0x8a   : > { %1855 = vsyncadd (%p1518_p5), [#allocation3 + $0x2], 4294967040  ;;  %v395_v3 = vld [vmem:[#allocation4 + $0xf8] sm:$0xff]  ;;  %v394_v4 = vld [vmem:[#allocation4 + $0xf0] sm:$0xff]  ;;  %vm409_vm0 = vcmask 1046528   ;;  %vm570_vm1 = vcmask 1045504   ;;  %s2652_s6 = scalar_lea.vmem %s2616_s3, %s2098_s13 }
  0x8b   : > { %1436 = vmatpush.msra.mxu1 %v395_v3  ;;  %1437 = vmatpush.msra.mxu2 %v395_v3  ;;  %v393_v5 = vld [vmem:[#allocation4 + $0xe8] sm:$0xff]  ;;  %v392_v6 = vld [vmem:[#allocation4 + $0xe0] sm:$0xff]  ;;  %v689_v7 = vld [vmem:[#allocation4 + $0x1f8] sm:$0xff]  ;;  %s1485_s13 = smul.u32 48, %s1890_s22  ;;  %s1266_s7 = sshll.u32 %s2148_s17, 4  ;;  %s1267_s7 = int_to_ptr.vmem [resolvable:$true] %s1266_s7 }
  0x8c   : > { %447 = vmatpush.msra.mxu0 %v395_v3  ;;  %v688_v8 = vld [vmem:[#allocation4 + $0x1f0] sm:$0xff]  ;;  %v391_v9 = vld [vmem:[#allocation4 + $0xd8] sm:$0xff]  ;;  %690 = vmatpush.msra.mxu3 %v689_v7  ;;  %v687_v11 = vld [vmem:[#allocation4 + $0x1e8] sm:$0xff]  ;;  %s2653_s9 = sand.u32 1, %s1866_s16   ;;  %s1786_s20 = scalar_lea.hbm %s2617_s4, 768 }
  0x8d   : > { %1438 = vmatpush.msra.mxu1 %v394_v4  ;;  %1439 = vmatpush.msra.mxu2 %v394_v4  ;;  %v390_v10 = vld [vmem:[#allocation4 + $0xd0] sm:$0xff]  ;;  %v686_v12 = vld [vmem:[#allocation4 + $0x1e0] sm:$0xff]  ;;  %v389_v13 = vld [vmem:[#allocation4 + $0xc8] sm:$0xff]  ;;  %s1252_s26 = scalar_lea.sflag [#allocation6], %s2653_s9 }
  0x8e   : > { %448 = vmatpush.msra.mxu0 %v394_v4  ;;  %691 = vmatpush.msra.mxu3 %v688_v8  ;;  %v685_v14 = vld [vmem:[#allocation4 + $0x1d8] sm:$0xff]  ;;  %v388_v15 = vld [vmem:[#allocation4 + $0xc0] sm:$0xff]  ;;  %v684_v16 = vld [vmem:[#allocation4 + $0x1d0] sm:$0xff] }
  0x8f   : > { %1440 = vmatpush.msra.mxu1 %v393_v5  ;;  %1441 = vmatpush.msra.mxu2 %v393_v5  ;;  %v387_v17 = vld [vmem:[#allocation4 + $0xb8] sm:$0xff]  ;;  %v683_v18 = vld [vmem:[#allocation4 + $0x1c8] sm:$0xff]  ;;  %v386_v19 = vld [vmem:[#allocation4 + $0xb0] sm:$0xff] }
  0x90   : > { %449 = vmatpush.msra.mxu0 %v393_v5  ;;  %692 = vmatpush.msra.mxu3 %v687_v11  ;;  %v682_v20 = vld [vmem:[#allocation4 + $0x1c0] sm:$0xff]  ;;  %v385_v21 = vld [vmem:[#allocation4 + $0xa8] sm:$0xff]  ;;  %v681_v22 = vld [vmem:[#allocation4 + $0x1b8] sm:$0xff] }
  0x91   : > { %1442 = vmatpush.msra.mxu1 %v392_v6  ;;  %1443 = vmatpush.msra.mxu2 %v392_v6  ;;  %v384_v23 = vld [vmem:[#allocation4 + $0xa0] sm:$0xff]  ;;  %v383_v24 = vld [vmem:[#allocation4 + $0x98] sm:$0xff]  ;;  %v680_v26 = vld [vmem:[#allocation4 + $0x1b0] sm:$0xff] }
  0x92   : > { %450 = vmatpush.msra.mxu0 %v392_v6  ;;  %693 = vmatpush.msra.mxu3 %v686_v12  ;;  %v2160_v25 = vld [vmem:[#allocation2 + $0x20] sm:$0xff]  ;;  %v2162_v27 = vld [vmem:[#allocation2 + $0x28] sm:$0xff]  ;;  %v679_v30 = vld [vmem:[#allocation4 + $0x1a8] sm:$0xff] }
  0x93   : > { %1444 = vmatpush.msra.mxu1 %v391_v9  ;;  %1445 = vmatpush.msra.mxu2 %v391_v9  ;;  %v2164_v28 = vld [vmem:[#allocation2 + $0x40] sm:$0xff]  ;;  %v2166_v29 = vld [vmem:[#allocation2 + $0x48] sm:$0xff]  ;;  %v382_v31 = vld [vmem:[#allocation4 + $0x90] sm:$0xff]  ;;  %v417_v33 = vrot.slane %v2160_v25, 1  ;;  %v419_v34 = vrot.slane %v2162_v27, 1 }
  0x94   : > { %451 = vmatpush.msra.mxu0 %v391_v9  ;;  %694 = vmatpush.msra.mxu3 %v685_v14  ;;  %v381_v32 = vld [vmem:[#allocation4 + $0x88] sm:$0xff]  ;;  %v425_v35 = vrot.slane %v2164_v28, 1  ;;  %v427_v36 = vrot.slane %v2166_v29, 1  ;;  %v678_v37 = vld [vmem:[#allocation4 + $0x1a0] sm:$0xff]  ;;  %v2172_v38 = vld [vmem:[#allocation2] sm:$0xff] }
  0x95   : > { %1446 = vmatpush.msra.mxu1 %v390_v10  ;;  %1447 = vmatpush.msra.mxu2 %v390_v10  ;;  %v2174_v39 = vld [vmem:[#allocation2 + $0x8] sm:$0xff]  ;;  %v677_v40 = vld [vmem:[#allocation4 + $0x198] sm:$0xff]  ;;  %v2179_v42 = vsel %vm409_vm0, %v417_v33, %v419_v34  ;;  %v410_v45 = vrot.slane %v2172_v38, 1  ;;  %v2188_v48 = vld [vmem:[#allocation2 + $0x30] sm:$0xff] }
  0x96   : > { %452 = vmatpush.msra.mxu0 %v390_v10  ;;  %695 = vmatpush.msra.mxu3 %v684_v16  ;;  %v380_v41 = vld [vmem:[#allocation4 + $0x80] sm:$0xff]  ;;  %v2184_v43 = vsel %vm409_vm0, %v425_v35, %v427_v36  ;;  %v569_v44 = vld [vmem:[#allocation4 + $0x178] sm:$0xff]  ;;  %v411_v46 = vrot.slane %v2174_v39, 1  ;;  %v2190_v49 = vld [vmem:[#allocation2 + $0x50] sm:$0xff]  ;;  %v421_v53 = vrot.slane %v2188_v48, 1 }
  0x97   : > { %1448 = vmatpush.msra.mxu1 %v389_v13  ;;  %1449 = vmatpush.msra.mxu2 %v389_v13  ;;  %v378_v47 = vld [vmem:[#allocation4 + $0x78] sm:$0xff]  ;;  %v676_v50 = vld [vmem:[#allocation4 + $0x190] sm:$0xff]  ;;  %v429_v54 = vrot.slane %v2190_v49, 1  ;;  %v675_v56 = vld [vmem:[#allocation4 + $0x188] sm:$0xff] }
  0x98   : > { %453 = vmatpush.msra.mxu0 %v389_v13  ;;  %696 = vmatpush.msra.mxu3 %v683_v18  ;;  %v568_v51 = vld [vmem:[#allocation4 + $0x170] sm:$0xff]  ;;  %v412_v55 = vsel %vm409_vm0, %v410_v45, %v411_v46  ;;  %v567_v57 = vld [vmem:[#allocation4 + $0x168] sm:$0xff]  ;;  %v771_v59 = vld [vmem:[#allocation4 + $0x278] sm:$0xff]  ;;  %v2200_v63 = vsel %vm409_vm0, %v419_v34, %v421_v53 }
  0x99   : > { %1450 = vmatpush.msra.mxu1 %v388_v15  ;;  %1451 = vmatpush.msra.mxu2 %v388_v15  ;;  %v377_v52 = vld [vmem:[#allocation4 + $0x70] sm:$0xff]  ;;  %v376_v58 = vld [vmem:[#allocation4 + $0x68] sm:$0xff]  ;;  %v674_v60 = vld [vmem:[#allocation4 + $0x180] sm:$0xff]  ;;  %v2203_v0 = vsel %vm409_vm0, %v427_v36, %v429_v54 }
  0x9a   : > { %454 = vmatpush.msra.mxu0 %v388_v15  ;;  %697 = vmatpush.msra.mxu3 %v682_v20  ;;  %v566_v61 = vld [vmem:[#allocation4 + $0x160] sm:$0xff]  ;;  %v565_v1 = vld [vmem:[#allocation4 + $0x158] sm:$0xff]  ;;  %v2205_v3 = vld [vmem:[#allocation2 + $0x38] sm:$0xff] }
  0x9b   : > { %1452 = vmatpush.msra.mxu1 %v387_v17  ;;  %1453 = vmatpush.msra.mxu2 %v387_v17  ;;  %v375_v62 = vld [vmem:[#allocation4 + $0x60] sm:$0xff]  ;;  %v374_v2 = vld [vmem:[#allocation4 + $0x58] sm:$0xff]  ;;  %v2207_v4 = vld [vmem:[#allocation2 + $0x58] sm:$0xff]  ;;  %v423_v10 = vrot.slane %v2205_v3, 1 }
  0x9c   : > { %455 = vmatpush.msra.mxu0 %v387_v17  ;;  %698 = vmatpush.msra.mxu3 %v681_v22  ;;  %v770_v5 = vld [vmem:[#allocation4 + $0x270] sm:$0xff]  ;;  %v2211_v8 = vld [vmem:[#allocation2 + $0x10] sm:$0xff]  ;;  %v431_v11 = vrot.slane %v2207_v4, 1  ;;  %v1038_v13 = vld [vmem:[#allocation4 + $0x3f8] sm:$0xff] }
  0x9d   : > { %1454 = vmatpush.msra.mxu1 %v386_v19  ;;  %1455 = vmatpush.msra.mxu2 %v386_v19  ;;  %v564_v6 = vld [vmem:[#allocation4 + $0x150] sm:$0xff]  ;;  %v769_v9 = vld [vmem:[#allocation4 + $0x268] sm:$0xff]  ;;  %v768_v16 = vld [vmem:[#allocation4 + $0x260] sm:$0xff]  ;;  %v413_v17 = vrot.slane %v2211_v8, 1 }
  0x9e   : > { %456 = vmatpush.msra.mxu0 %v386_v19  ;;  %699 = vmatpush.msra.mxu3 %v680_v26  ;;  %v373_v7 = vld [vmem:[#allocation4 + $0x50] sm:$0xff]  ;;  %v563_v14 = vld [vmem:[#allocation4 + $0x148] sm:$0xff]  ;;  %v562_v19 = vld [vmem:[#allocation4 + $0x140] sm:$0xff]  ;;  %v2223_v22 = vsel %vm409_vm0, %v429_v54, %v431_v11 }
  0x9f   : > { %1456 = vmatpush.msra.mxu1 %v385_v21  ;;  %1457 = vmatpush.msra.mxu2 %v385_v21  ;;  %v2215_v12 = vld [vmem:[#allocation2 + $0x18] sm:$0xff]  ;;  %v372_v15 = vld [vmem:[#allocation4 + $0x48] sm:$0xff]  ;;  %v371_v20 = vld [vmem:[#allocation4 + $0x40] sm:$0xff]  ;;  %v414_v26 = vsel %vm409_vm0, %v411_v46, %v413_v17 }
  0xa0   : > { %457 = vmatpush.msra.mxu0 %v385_v21  ;;  %700 = vmatpush.msra.mxu3 %v679_v30  ;;  %v1037_v18 = vld [vmem:[#allocation4 + $0x3f0] sm:$0xff]  ;;  %v2220_v21 = vsel %vm409_vm0, %v421_v53, %v423_v10  ;;  %v2228_v30 = vld [vmem:[#allocation2 + $0x60] sm:$0xff]  ;;  %v1036_v36 = vld [vmem:[#allocation4 + $0x3e8] sm:$0xff] }
  0xa1   : > { %1458 = vmatpush.msra.mxu1 %v384_v23  ;;  %1459 = vmatpush.msra.mxu2 %v384_v23  ;;  %v767_v34 = vld [vmem:[#allocation4 + $0x258] sm:$0xff]  ;;  %v1035_v45 = vld [vmem:[#allocation4 + $0x3e0] sm:$0xff] }
  0xa2   : > { %458 = vmatpush.msra.mxu0 %v384_v23  ;;  %701 = vmatpush.msra.mxu3 %v678_v37  ;;  %v561_v23 = vld [vmem:[#allocation4 + $0x138] sm:$0xff]  ;;  %v559_v37 = vld [vmem:[#allocation4 + $0x128] sm:$0xff]  ;;  %v558_v46 = vld [vmem:[#allocation4 + $0x120] sm:$0xff] }
  0xa3   : > { %1460 = vmatpush.msra.mxu1 %v383_v24  ;;  %1461 = vmatpush.msra.mxu2 %v383_v24  ;;  %v366_v54 = vld [vmem:[#allocation4 + $0x18] sm:$0xff] }
  0xa4   : > { %459 = vmatpush.msra.mxu0 %v383_v24  ;;  %702 = vmatpush.msra.mxu3 %v677_v40  ;;  %v370_v24 = vld [vmem:[#allocation4 + $0x38] sm:$0xff]  ;;  %v368_v40 = vld [vmem:[#allocation4 + $0x28] sm:$0xff] }
  0xa5   : > { %1462 = vmatpush.msra.mxu1 %v382_v31  ;;  %1463 = vmatpush.msra.mxu2 %v382_v31 }
  0xa6   : > { %460 = vmatpush.msra.mxu0 %v382_v31  ;;  %703 = vmatpush.msra.mxu3 %v676_v50  ;;  %v560_v31 = vld [vmem:[#allocation4 + $0x130] sm:$0xff]  ;;  %v415_v50 = vrot.slane %v2215_v12, 1 }
  0xa7   : > { %1464 = vmatpush.msra.mxu1 %v381_v32  ;;  %1465 = vmatpush.msra.mxu2 %v381_v32 }
  0xa8   : > { %461 = vmatpush.msra.mxu0 %v381_v32  ;;  %704 = vmatpush.msra.mxu3 %v675_v56  ;;  %v369_v32 = vld [vmem:[#allocation4 + $0x30] sm:$0xff]  ;;  %v764_v56 = vld [vmem:[#allocation4 + $0x240] sm:$0xff] }
  0xa9   : > { %1466 = vmatpush.msra.mxu1 %v380_v41  ;;  %1467 = vmatpush.msra.mxu2 %v380_v41 }
  0xaa   : > { %475 = vmatmul.f32.vlgmr.msra.gmra.mxu1 %v2179_v42  ;;  %487 = vmatmul.f32.vlgmr.msra.gmra.mxu2 %v2184_v43 }
  0xab   : > { %608 = vmatpush.msrb.mxu2 %v569_v44  ;;  %500 = vmatpush.msrb.mxu1 %v378_v47  ;;  %v766_v44 = vld [vmem:[#allocation4 + $0x250] sm:$0xff]  ;;  %v367_v47 = vld [vmem:[#allocation4 + $0x20] sm:$0xff] }
  0xac   : > { %462 = vmatpush.msra.mxu0 %v380_v41  ;;  %705 = vmatpush.msra.mxu3 %v674_v60  ;;  %v433_v41 = vrot.slane %v2228_v30, 1  ;;  %v364_v60 = vld [vmem:[#allocation4 + $0x8] sm:$0xff] }
  0xad   : > { %609 = vmatpush.msrb.mxu2 %v568_v51  ;;  %501 = vmatpush.msrb.mxu1 %v377_v52  ;;  %v765_v51 = vld [vmem:[#allocation4 + $0x248] sm:$0xff]  ;;  %v2238_v52 = vsel %vm409_vm0, %v423_v10, %v425_v35  ;;  %v556_v35 = vld [vmem:[#allocation4 + $0x110] sm:$0xff] }
  0xae   : > { %463 = vmatmul.f32.vlgmr.msra.gmra.mxu0 %v412_v55  ;;  %706 = vmatmul.f32.vlgmr.msra.gmra.mxu3 %v2215_v12  ;;  %v2243_v53 = vsel %vm409_vm0, %v431_v11, %v433_v41  ;;  %v557_v55 = vld [vmem:[#allocation4 + $0x118] sm:$0xff] }
  0xaf   : > { %610 = vmatpush.msrb.mxu2 %v567_v57  ;;  %502 = vmatpush.msrb.mxu1 %v376_v58  ;;  %v416_v57 = vsel %vm409_vm0, %v413_v17, %v415_v50  ;;  %v365_v58 = vld [vmem:[#allocation4 + $0x10] sm:$0xff]  ;;  %v956_v11 = vld [vmem:[#allocation4 + $0x378] sm:$0xff] }
  0xb0   : > { %784 = vmatpush.msrb.mxu0 %v771_v59  ;;  %1051 = vmatpush.msrb.mxu3 %v1038_v13  ;;  %v763_v59 = vld [vmem:[#allocation4 + $0x238] sm:$0xff]  ;;  %v760_v13 = vld [vmem:[#allocation4 + $0x220] sm:$0xff]  ;;  %v955_v17 = vld [vmem:[#allocation4 + $0x370] sm:$0xff] }
  0xb1   : > { %611 = vmatpush.msrb.mxu2 %v566_v61  ;;  %503 = vmatpush.msrb.mxu1 %v375_v62  ;;  %v571_v61 = vrot.slane %v2172_v38, 2  ;;  %v572_v62 = vrot.slane %v2174_v39, 2 }
  0xb2   : > { %478 = vmatmul.f32.gmra.mxu1 %v2200_v63  ;;  %490 = vmatmul.f32.gmra.mxu2 %v2203_v0 }
  0xb3   : > { %612 = vmatpush.msrb.mxu2 %v565_v1  ;;  %504 = vmatpush.msrb.mxu1 %v374_v2  ;;  %v555_v1 = vld [vmem:[#allocation4 + $0x108] sm:$0xff]  ;;  %v762_v2 = vld [vmem:[#allocation4 + $0x230] sm:$0xff]  ;;  %v573_v10 = vsel %vm570_vm1, %v571_v61, %v572_v62  ;;  %v858_v61 = vld [vmem:[#allocation4 + $0x2c0] sm:$0xff] }
  0xb4   : > { %785 = vmatpush.msrb.mxu0 %v770_v5  ;;  %1052 = vmatpush.msrb.mxu3 %v1037_v18  ;;  %v363_v5 = vld [vmem:[#allocation4] sm:$0xff]  ;;  %v574_v18 = vrot.slane %v2211_v8, 2 }
  0xb5   : > { %613 = vmatpush.msrb.mxu2 %v564_v6  ;;  %505 = vmatpush.msrb.mxu1 %v373_v7  ;;  %v1034_v6 = vld [vmem:[#allocation4 + $0x3d8] sm:$0xff]  ;;  %v554_v7 = vld [vmem:[#allocation4 + $0x100] sm:$0xff] }
  0xb6   : > { %786 = vmatpush.msrb.mxu0 %v769_v9  ;;  %709 = vmatmul.f32.gmra.mxu3 %v2160_v25  ;;  %v761_v9 = vld [vmem:[#allocation4 + $0x228] sm:$0xff] }
  0xb7   : > { %614 = vmatpush.msrb.mxu2 %v563_v14  ;;  %506 = vmatpush.msrb.mxu1 %v372_v15  ;;  %v418_v14 = vsel %vm409_vm0, %v415_v50, %v417_v33  ;;  %v865_v15 = vld [vmem:[#allocation4 + $0x2f8] sm:$0xff]  ;;  %v757_v33 = vld [vmem:[#allocation4 + $0x208] sm:$0xff]  ;;  %v860_v50 = vld [vmem:[#allocation4 + $0x2d0] sm:$0xff] }
  0xb8   : > { %787 = vmatpush.msrb.mxu0 %v768_v16  ;;  %1053 = vmatpush.msrb.mxu3 %v1036_v36  ;;  %v759_v16 = vld [vmem:[#allocation4 + $0x218] sm:$0xff] }
  0xb9   : > { %615 = vmatpush.msrb.mxu2 %v562_v19  ;;  %507 = vmatpush.msrb.mxu1 %v371_v20  ;;  %v864_v19 = vld [vmem:[#allocation4 + $0x2f0] sm:$0xff]  ;;  %v952_v36 = vld [vmem:[#allocation4 + $0x358] sm:$0xff] }
  0xba   : > { %481 = vmatmul.f32.gmra.mxu1 %v2220_v21  ;;  %493 = vmatmul.f32.gmra.mxu2 %v2223_v22  ;;  %v758_v20 = vld [vmem:[#allocation4 + $0x210] sm:$0xff] }
  0xbb   : > { %616 = vmatpush.msrb.mxu2 %v561_v23  ;;  %508 = vmatpush.msrb.mxu1 %v370_v24  ;;  %v954_v23 = vld [vmem:[#allocation4 + $0x368] sm:$0xff] }
  0xbc   : > { %466 = vmatmul.f32.gmra.mxu0 %v414_v26  ;;  %1054 = vmatpush.msrb.mxu3 %v1035_v45  ;;  %v863_v24 = vld [vmem:[#allocation4 + $0x2e8] sm:$0xff]  ;;  %v1033_v26 = vld [vmem:[#allocation4 + $0x3d0] sm:$0xff] }
  0xbd   : > { %617 = vmatpush.msrb.mxu2 %v560_v31  ;;  %509 = vmatpush.msrb.mxu1 %v369_v32  ;;  %v953_v31 = vld [vmem:[#allocation4 + $0x360] sm:$0xff]  ;;  %v951_v45 = vld [vmem:[#allocation4 + $0x350] sm:$0xff] }
  0xbe   : > { %788 = vmatpush.msrb.mxu0 %v767_v34  ;;  %712 = vmatmul.f32.gmra.mxu3 %v2162_v27  ;;  %v756_v32 = vld [vmem:[#allocation4 + $0x200] sm:$0xff] }
  0xbf   : > { %618 = vmatpush.msrb.mxu2 %v559_v37  ;;  %510 = vmatpush.msrb.mxu1 %v368_v40  ;;  %v862_v34 = vld [vmem:[#allocation4 + $0x2e0] sm:$0xff]  ;;  %v2260_v37 = vld [vmem:[#allocation4 + $0x478] sm:$0xff] }
  0xc0   : > { %789 = vmatpush.msrb.mxu0 %v766_v44  ;;  %1055 = vmatpush.msrb.mxu3 %v1034_v6  ;;  %v861_v40 = vld [vmem:[#allocation4 + $0x2d8] sm:$0xff]  ;;  %v576_v44 = vrot.slane %v2215_v12, 2  ;;  %v2284_v6 = vld [vmem:[#allocation4 + $0x448] sm:$0xff] }
  0xc1   : > { %619 = vmatpush.msrb.mxu2 %v558_v46  ;;  %511 = vmatpush.msrb.mxu1 %v367_v47  ;;  %v2263_v46 = vld [vmem:[#allocation4 + $0x470] sm:$0xff]  ;;  %v1032_v47 = vld [vmem:[#allocation4 + $0x3c8] sm:$0xff] }
  0xc2   : > { %790 = vmatpush.msrb.mxu0 %v765_v51  ;;  %484 = vmatmul.f32.gmra.mxu1 %v2238_v52  ;;  %v950_v51 = vld [vmem:[#allocation4 + $0x348] sm:$0xff] }
  0xc3   : > { %496 = vmatmul.f32.gmra.mxu2 %v2243_v53  ;;  %512 = vmatpush.msrb.mxu1 %v366_v54  ;;  %v1031_v54 = vld [vmem:[#allocation4 + $0x3c0] sm:$0xff] }
  0xc4   : > { %620 = vmatpush.msrb.mxu2 %v557_v55  ;;  %791 = vmatpush.msrb.mxu0 %v764_v56  ;;  %v577_v55 = vsel %vm570_vm1, %v574_v18, %v576_v44  ;;  %v2271_v56 = vld [vmem:[#allocation4 + $0x460] sm:$0xff] }
  0xc5   : > { %469 = vmatmul.f32.gmra.mxu0 %v416_v57  ;;  %513 = vmatpush.msrb.mxu1 %v365_v58  ;;  %v859_v57 = vld [vmem:[#allocation4 + $0x2c8] sm:$0xff]  ;;  %v949_v58 = vld [vmem:[#allocation4 + $0x340] sm:$0xff] }
  0xc6   : > { %621 = vmatpush.msrb.mxu2 %v556_v35  ;;  %792 = vmatpush.msrb.mxu0 %v763_v59  ;;  %v2275_v35 = vld [vmem:[#allocation4 + $0x458] sm:$0xff] }
  0xc7   : > { %514 = vmatpush.msrb.mxu1 %v364_v60  ;;  %715 = vmatmul.f32.gmra.mxu3 %v2188_v48  ;;  %v1030_v59 = vld [vmem:[#allocation4 + $0x3b8] sm:$0xff]  ;;  %v578_v60 = vrot.slane %v2160_v25, 2 }
  0xc8   : > { %622 = vmatpush.msrb.mxu2 %v555_v1  ;;  %793 = vmatpush.msrb.mxu0 %v762_v2  ;;  %v2280_v1 = vld [vmem:[#allocation4 + $0x450] sm:$0xff]  ;;  %v857_v2 = vld [vmem:[#allocation4 + $0x2b8] sm:$0xff] }
  0xc9   : > { %515 = vmatpush.msrb.mxu1 %v363_v5  ;;  %1056 = vmatpush.msrb.mxu3 %v1033_v26  ;;  %v947_v5 = vld [vmem:[#allocation4 + $0x330] sm:$0xff] }
  0xca   : > { %623 = vmatpush.msrb.mxu2 %v554_v7  ;;  %794 = vmatpush.msrb.mxu0 %v761_v9  ;;  %v2287_v7 = vsel %vm570_vm1, %v576_v44, %v578_v60  ;;  %v580_v9 = vrot.slane %v2162_v27, 2  ;;  %v1025_v26 = vld [vmem:[#allocation4 + $0x390] sm:$0xff]  ;;  %v1121_v44 = vld [vmem:[#allocation4 + $0x420] sm:$0xff] }
  0xcb   : > { %516 = vmatmul.f32.vlgmr.msrb.gmra.mxu1 %v2172_v38  ;;  %624 = vmatmul.f32.vlgmr.msrb.gmra.mxu2 %v573_v10  ;;  %v575_v38 = vsel %vm570_vm1, %v572_v62, %v574_v18  ;;  %v948_v62 = vld [vmem:[#allocation4 + $0x338] sm:$0xff]  ;;  %v856_v10 = vld [vmem:[#allocation4 + $0x2b0] sm:$0xff] }
  0xcc   : > { %957 = vmatpush.msra.mxu2 %v956_v11  ;;  %795 = vmatpush.msrb.mxu0 %v760_v13  ;;  %v946_v11 = vld [vmem:[#allocation4 + $0x328] sm:$0xff]  ;;  %v2295_v13 = vld [vmem:[#allocation4 + $0x440] sm:$0xff]  ;;  %v1026_v18 = vld [vmem:[#allocation4 + $0x398] sm:$0xff] }
  0xcd   : > { %472 = vmatmul.f32.gmra.mxu0 %v418_v14  ;;  %875 = vmatpush.msra.mxu1 %v865_v15  ;;  %v582_v15 = vrot.slane %v2188_v48, 2 }
  0xce   : > { %796 = vmatpush.msrb.mxu0 %v759_v16  ;;  %958 = vmatpush.msra.mxu2 %v955_v17  ;;  %v945_v16 = vld [vmem:[#allocation4 + $0x320] sm:$0xff]  ;;  %v2306_v17 = vld [vmem:[#allocation4 + $0x438] sm:$0xff] }
  0xcf   : > { %876 = vmatpush.msra.mxu1 %v864_v19  ;;  %718 = vmatmul.f32.gmra.mxu3 %v2205_v3  ;;  %v854_v19 = vld [vmem:[#allocation4 + $0x2a0] sm:$0xff] }
  0xd0   : > { %797 = vmatpush.msrb.mxu0 %v758_v20  ;;  %959 = vmatpush.msra.mxu2 %v954_v23  ;;  %v944_v20 = vld [vmem:[#allocation4 + $0x318] sm:$0xff]  ;;  %v2315_v23 = vld [vmem:[#allocation4 + $0x430] sm:$0xff] }
  0xd1   : > { %877 = vmatpush.msra.mxu1 %v863_v24  ;;  %1057 = vmatpush.msrb.mxu3 %v1032_v47  ;;  %v584_v24 = vrot.slane %v2205_v3, 2 }
  0xd2   : > { %798 = vmatpush.msrb.mxu0 %v757_v33  ;;  %960 = vmatpush.msra.mxu2 %v953_v31  ;;  %v853_v33 = vld [vmem:[#allocation4 + $0x298] sm:$0xff]  ;;  %v943_v31 = vld [vmem:[#allocation4 + $0x310] sm:$0xff] }
  0xd3   : > { %519 = vmatmul.f32.gmra.mxu1 %v2174_v39  ;;  %627 = vmatmul.f32.gmra.mxu2 %v575_v38  ;;  %v2267_v39 = vld [vmem:[#allocation4 + $0x468] sm:$0xff] }
  0xd4   : > { %799 = vmatpush.msrb.mxu0 %v756_v32  ;;  %878 = vmatpush.msra.mxu1 %v862_v34  ;;  %v2320_v38 = vld [vmem:[#allocation4 + $0x428] sm:$0xff]  ;;  %v586_v34 = vrot.slane %v2164_v28, 2 }
  0xd5   : > { %800 = vmatmul.f32.vlgmr.msrb.gmra.mxu0 %v418_v14  ;;  %961 = vmatpush.msra.mxu2 %v952_v36  ;;  %v1027_v14 = vld [vmem:[#allocation4 + $0x3a0] sm:$0xff]  ;;  %v1024_v32 = vld [vmem:[#allocation4 + $0x388] sm:$0xff]  ;;  %v852_v36 = vld [vmem:[#allocation4 + $0x290] sm:$0xff] }
  0xd6   : > { %1142 = vmatpush.msra.mxu0 %v2260_v37  ;;  %879 = vmatpush.msra.mxu1 %v861_v40  ;;  %v942_v40 = vld [vmem:[#allocation4 + $0x308] sm:$0xff]  ;;  %v2333_v47 = vsel %vm570_vm1, %v584_v24, %v586_v34 }
  0xd7   : > { %962 = vmatpush.msra.mxu2 %v951_v45  ;;  %1058 = vmatpush.msrb.mxu3 %v1031_v54  ;;  %v1023_v45 = vld [vmem:[#allocation4 + $0x380] sm:$0xff] }
  0xd8   : > { %1143 = vmatpush.msra.mxu0 %v2263_v46  ;;  %880 = vmatpush.msra.mxu1 %v860_v50  ;;  %v851_v50 = vld [vmem:[#allocation4 + $0x288] sm:$0xff]  ;;  %v2339_v54 = vld [vmem:[#allocation2 + $0x68] sm:$0xff] }
  0xd9   : > { %963 = vmatpush.msra.mxu2 %v950_v51  ;;  %1059 = vmatpush.msrb.mxu3 %v1030_v59  ;;  %v588_v51 = vrot.slane %v2166_v29, 2  ;;  %v590_v59 = vrot.slane %v2190_v49, 2 }
  0xda   : > { %1144 = vmatpush.msra.mxu0 %v2267_v39  ;;  %881 = vmatpush.msra.mxu1 %v859_v57  ;;  %v1120_v57 = vld [vmem:[#allocation4 + $0x418] sm:$0xff] }
  0xdb   : > { %522 = vmatmul.f32.gmra.mxu1 %v2211_v8  ;;  %630 = vmatmul.f32.gmra.mxu2 %v577_v55  ;;  %v1029_v8 = vld [vmem:[#allocation4 + $0x3b0] sm:$0xff]  ;;  %v941_v55 = vld [vmem:[#allocation4 + $0x300] sm:$0xff] }
  0xdc   : > { %1145 = vmatpush.msra.mxu0 %v2271_v56  ;;  %964 = vmatpush.msra.mxu2 %v949_v58  ;;  %v2345_v58 = vsel %vm570_vm1, %v586_v34, %v588_v51 }
  0xdd   : > { %803 = vmatmul.f32.gmra.mxu0 %v2179_v42  ;;  %721 = vmatmul.f32.gmra.mxu3 %v2164_v28  ;;  %v1028_v42 = vld [vmem:[#allocation4 + $0x3a8] sm:$0xff] }
  0xde   : > { %1146 = vmatpush.msra.mxu0 %v2275_v35  ;;  %882 = vmatpush.msra.mxu1 %v858_v61  ;;  %v592_v61 = vrot.slane %v2207_v4, 2 }
  0xdf   : > { %965 = vmatpush.msra.mxu2 %v948_v62  ;;  %1060 = vmatpush.msrb.mxu3 %v1029_v8  ;;  %v775_v62 = vrot.slane %v2339_v54, 1 }
  0xe0   : > { %1147 = vmatpush.msra.mxu0 %v2280_v1  ;;  %883 = vmatpush.msra.mxu1 %v857_v2  ;;  %v594_v2 = vrot.slane %v2228_v30, 2 }
  0xe1   : > { %966 = vmatpush.msra.mxu2 %v947_v5  ;;  %1061 = vmatpush.msrb.mxu3 %v1028_v42  ;;  %v776_v8 = vsel %vm409_vm0, %v433_v41, %v775_v62 }
  0xe2   : > { %1148 = vmatpush.msra.mxu0 %v2284_v6  ;;  %884 = vmatpush.msra.mxu1 %v856_v10  ;;  %v2386_v5 = vsel %vm570_vm1, %v592_v61, %v594_v2 }
  0xe3   : > { %525 = vmatmul.f32.gmra.mxu1 %v2215_v12  ;;  %633 = vmatmul.f32.gmra.mxu2 %v2287_v7  ;;  %v2300_v12 = vsel %vm570_vm1, %v578_v60, %v580_v9  ;;  %v2352_v60 = vld [vmem:[#allocation2 + $0x70] sm:$0xff] }
  0xe4   : > { %967 = vmatpush.msra.mxu2 %v946_v11  ;;  %1149 = vmatpush.msra.mxu0 %v2295_v13 }
  0xe5   : > { %806 = vmatmul.f32.gmra.mxu0 %v2200_v63  ;;  %724 = vmatmul.f32.gmra.mxu3 %v2166_v29  ;;  %v855_v63 = vld [vmem:[#allocation4 + $0x2a8] sm:$0xff] }
  0xe6   : > { %1062 = vmatpush.msrb.mxu3 %v1027_v14  ;;  %885 = vmatpush.msra.mxu1 %v855_v63 }
  0xe7   : > { %968 = vmatpush.msra.mxu2 %v945_v16  ;;  %1150 = vmatpush.msra.mxu0 %v2306_v17 }
  0xe8   : > { %886 = vmatpush.msra.mxu1 %v854_v19  ;;  %1063 = vmatpush.msrb.mxu3 %v1026_v18 }
  0xe9   : > { %969 = vmatpush.msra.mxu2 %v944_v20  ;;  %1151 = vmatpush.msra.mxu0 %v2315_v23 }
  0xea   : > { %1064 = vmatpush.msrb.mxu3 %v1025_v26  ;;  %887 = vmatpush.msra.mxu1 %v853_v33  ;;  %v2436_v26 = vld [vmem:[#allocation2 + $0x80] sm:$0xff] }
  0xeb   : > { %528 = vmatmul.f32.gmra.mxu1 %v2160_v25  ;;  %636 = vmatmul.f32.gmra.mxu2 %v2300_v12  ;;  %v2311_v25 = vsel %vm570_vm1, %v580_v9, %v582_v15 }
  0xec   : > { %970 = vmatpush.msra.mxu2 %v943_v31  ;;  %1152 = vmatpush.msra.mxu0 %v2320_v38 }
  0xed   : > { %809 = vmatmul.f32.gmra.mxu0 %v2220_v21  ;;  %727 = vmatmul.f32.gmra.mxu3 %v2190_v49 }
  0xee   : > { %1065 = vmatpush.msrb.mxu3 %v1024_v32  ;;  %888 = vmatpush.msra.mxu1 %v852_v36 }
  0xef   : > { %971 = vmatpush.msra.mxu2 %v942_v40  ;;  %1153 = vmatpush.msra.mxu0 %v1121_v44 }
  0xf0   : > { %1066 = vmatpush.msrb.mxu3 %v1023_v45  ;;  %889 = vmatpush.msra.mxu1 %v851_v50 }
  0xf1   : > { %972 = vmatpush.msra.mxu2 %v941_v55  ;;  %1154 = vmatpush.msra.mxu0 %v1120_v57 }
  0xf2   : > { %1468 = vmatpush.msra.mxu3 %v2260_v37  ;;  %v850_v37 = vld [vmem:[#allocation4 + $0x280] sm:$0xff] }
  0xf3   : > { %531 = vmatmul.f32.gmra.mxu1 %v2162_v27  ;;  %639 = vmatmul.f32.gmra.mxu2 %v2311_v25  ;;  %v2324_v27 = vsel %vm570_vm1, %v582_v15, %v584_v24 }
  0xf4   : > { %1469 = vmatpush.msra.mxu3 %v2263_v46  ;;  %890 = vmatpush.msra.mxu1 %v850_v37  ;;  %v1119_v46 = vld [vmem:[#allocation4 + $0x410] sm:$0xff] }
  0xf5   : > { %812 = vmatmul.f32.gmra.mxu0 %v2238_v52  ;;  %730 = vmatmul.f32.gmra.mxu3 %v2207_v4 }
  0xf6   : > { %1470 = vmatpush.msra.mxu3 %v2267_v39  ;;  %1155 = vmatpush.msra.mxu0 %v1119_v46  ;;  %v1118_v39 = vld [vmem:[#allocation4 + $0x408] sm:$0xff] }
  0xf8   : > { %1471 = vmatpush.msra.mxu3 %v2271_v56  ;;  %v2359_v56 = vsel %vm570_vm1, %v588_v51, %v590_v59  ;;  %1156 = vmatpush.msra.mxu0 %v1118_v39 }
  0xfa   : > { %1472 = vmatpush.msra.mxu3 %v2275_v35  ;;  %v1117_v35 = vld [vmem:[#allocation4 + $0x400] sm:$0xff] }
  0xfb   : > { %534 = vmatmul.f32.gmra.mxu1 %v2188_v48  ;;  %642 = vmatmul.f32.gmra.mxu2 %v2324_v27 }
  0xfc   : > { %1473 = vmatpush.msra.mxu3 %v2280_v1  ;;  %1157 = vmatpush.msra.mxu0 %v1117_v35  ;;  %v2372_v1 = vsel %vm570_vm1, %v590_v59, %v592_v61 }
  0xfd   : > { %815 = vmatmul.f32.gmra.mxu0 %v2184_v43  ;;  %733 = vmatmul.f32.gmra.mxu3 %v2228_v30 }
  0xfe   : > { %1474 = vmatpush.msra.mxu3 %v2284_v6  ;;  %v2391_v6 = vld [vmem:[#allocation2 + $0x78] sm:$0xff] }
  0xff   : > { %v779_v42 = vrot.slane %v2391_v6, 1 }
 0x100   : > { %1475 = vmatpush.msra.mxu3 %v2295_v13 }
 0x102   : > { %1476 = vmatpush.msra.mxu3 %v2306_v17 }
 0x103   : > { %537 = vmatmul.f32.gmra.mxu1 %v2205_v3  ;;  %645 = vmatmul.f32.gmra.mxu2 %v2333_v47 }
 0x104   : > { %1477 = vmatpush.msra.mxu3 %v2315_v23 }
 0x105   : > { %818 = vmatmul.f32.gmra.mxu0 %v2203_v0  ;;  %736 = vmatmul.f32.gmra.mxu3 %v2339_v54 }
 0x106   : > { %1478 = vmatpush.msra.mxu3 %v2320_v38  ;;  %v1042_v38 = vrot.slane %v2436_v26, 1 }
 0x108   : > { %1479 = vmatpush.msra.mxu3 %v1121_v44  ;;  %v2447_v44 = vld [vmem:[#allocation2 + $0x88] sm:$0xff] }
 0x109   : > { %v1044_v55 = vrot.slane %v2447_v44, 1 }
 0x10a   : > { %1480 = vmatpush.msra.mxu3 %v1120_v57 }
 0x10b   : > { %540 = vmatmul.f32.gmra.mxu1 %v2164_v28  ;;  %648 = vmatmul.f32.gmra.mxu2 %v2345_v58 }
 0x10c   : > { %1481 = vmatpush.msra.mxu3 %v1119_v46 }
 0x10d   : > { %821 = vmatmul.f32.gmra.mxu0 %v2223_v22  ;;  %739 = vmatmul.f32.gmra.mxu3 %v2352_v60 }
 0x10e   : > { %1482 = vmatpush.msra.mxu3 %v1118_v39 }
 0x110   : > { %1483 = vmatpush.msra.mxu3 %v1117_v35  ;;  %v362_v35 = vld [vmem:[#allocation2 + $0x90] sm:$0xff] }
 0x113   : > { %543 = vmatmul.f32.gmra.mxu1 %v2166_v29  ;;  %651 = vmatmul.f32.gmra.mxu2 %v2359_v56 }
 0x115   : > { %824 = vmatmul.f32.gmra.mxu0 %v2243_v53  ;;  %1067 = vmatmul.f32.vlgmr.msrb.gmra.mxu3 %v2220_v21  ;;  %v777_v21 = vrot.slane %v2352_v60, 1 }
 0x117   : > { %v778_v41 = vsel %vm409_vm0, %v775_v62, %v777_v21  ;;  %v868_v62 = vrot.slane %v2352_v60, 2 }
 0x11b   : > { %546 = vmatmul.f32.gmra.mxu1 %v2190_v49  ;;  %654 = vmatmul.f32.gmra.mxu2 %v2372_v1 }
 0x11d   : > { %827 = vmatmul.f32.gmra.mxu0 %v776_v8  ;;  %1070 = vmatmul.f32.gmra.mxu3 %v2238_v52  ;;  %v780_v52 = vsel %vm409_vm0, %v777_v21, %v779_v42 }
 0x123   : > { %549 = vmatmul.f32.gmra.mxu1 %v2207_v4  ;;  %657 = vmatmul.f32.gmra.mxu2 %v2386_v5 }
 0x125   : > { %830 = vmatmul.f32.gmra.mxu0 %v778_v41  ;;  %1073 = vmatmul.f32.gmra.mxu3 %v2184_v43 }
 0x127   : > { %v2394_v9 = vpop.f32.mrf.mxu1 }
 0x12b   : > { %891 = vmatmul.f32.vlgmr.msra.gmra.mxu1 %v2287_v7  ;;  %973 = vmatmul.f32.vlgmr.msra.gmra.mxu2 %v2188_v48  ;;  %v464_v13 = vpop.f32.mrf.mxu0 }
 0x12d   : > { %833 = vmatmul.f32.gmra.mxu0 %v780_v52  ;;  %v2402_v10 = vpop.f32.mrf.mxu2  ;;  %1076 = vmatmul.f32.gmra.mxu3 %v2203_v0 }
 0x12f   : > { %v2404_v11 = vpop.f32.mrf.mxu1 }
 0x131   : > { %v707_v48 = vpop.f32.mrf.mxu3 }
 0x133   : > { %894 = vmatmul.f32.gmra.mxu1 %v2300_v12  ;;  %976 = vmatmul.f32.gmra.mxu2 %v2205_v3 }
 0x135   : > { %1158 = vmatmul.f32.vlgmr.msra.gmra.mxu0 %v2324_v27  ;;  %v2410_v43 = vpop.f32.mrf.mxu2  ;;  %1079 = vmatmul.f32.gmra.mxu3 %v2223_v22 }
 0x137   : > { %v2412_v14 = vpop.f32.mrf.mxu1 }
 0x139   : > { %v467_v7 = vpop.f32.mrf.mxu0  ;;  %v710_v3 = vpop.f32.mrf.mxu3 }
 0x13b   : > { %897 = vmatmul.f32.gmra.mxu1 %v2311_v25  ;;  %979 = vmatmul.f32.gmra.mxu2 %v2164_v28 }
 0x13d   : > { %1161 = vmatmul.f32.gmra.mxu0 %v2333_v47  ;;  %v2418_v0 = vpop.f32.mrf.mxu2  ;;  %1082 = vmatmul.f32.gmra.mxu3 %v2243_v53 }
 0x13f   : > { %v2420_v12 = vpop.f32.mrf.mxu1 }
 0x141   : > { %v713_v17 = vpop.f32.mrf.mxu3 }
 0x142   : > { %v470_v63 = vpop.f32.mrf.mxu0 }
 0x143   : > { %900 = vmatmul.f32.gmra.mxu1 %v2324_v27  ;;  %982 = vmatmul.f32.gmra.mxu2 %v2166_v29 }
 0x145   : > { %1164 = vmatmul.f32.gmra.mxu0 %v2345_v58  ;;  %1085 = vmatmul.f32.gmra.mxu3 %v776_v8 }
 0x146   : > { %v2426_v22 = vpop.f32.mrf.mxu2 }
 0x148   : > { %v517_v28 = vpop.f32.mrf.mxu1 }
 0x149   : > { %v518_v15 = vadd.f32 %v517_v28, %v464_v13 }
 0x14a   : > { %v473_v16 = vpop.f32.mrf.mxu0  ;;  %v716_v23 = vpop.f32.mrf.mxu3 }
 0x14b   : > { %903 = vmatmul.f32.gmra.mxu1 %v2333_v47  ;;  %985 = vmatmul.f32.gmra.mxu2 %v2190_v49  ;;  %v866_v47 = vrot.slane %v2339_v54, 2 }
 0x14d   : > { %1167 = vmatmul.f32.gmra.mxu0 %v2359_v56  ;;  %1088 = vmatmul.f32.gmra.mxu3 %v778_v41  ;;  %v867_v46 = vsel %vm570_vm1, %v594_v2, %v866_v47 }
 0x14e   : > { %v625_v53 = vpop.f32.mrf.mxu2 }
 0x14f   : > { %v661_v18 = vadd.f32 %v625_v53, %v518_v15 }
 0x150   : > { %v520_v19 = vpop.f32.mrf.mxu1 }
 0x151   : > { %v521_v29 = vadd.f32 %v520_v19, %v467_v7  ;;  %v743_v25 = vadd.f32 %v707_v48, %v661_v18  ;;  %v870_v7 = vrot.slane %v2391_v6, 2 }
 0x152   : > { %v801_v20 = vpop.f32.mrf.mxu0  ;;  %v719_v36 = vpop.f32.mrf.mxu3 }
 0x153   : > { %v2431_v24 = vadd.f32 %v801_v20, %v743_v25  ;;  %906 = vmatmul.f32.gmra.mxu1 %v2345_v58  ;;  %988 = vmatmul.f32.gmra.mxu2 %v2207_v4  ;;  %v1043_v4 = vsel %vm409_vm0, %v779_v42, %v1042_v38 }
 0x155   : > { %1170 = vmatmul.f32.gmra.mxu0 %v2372_v1  ;;  %1091 = vmatmul.f32.gmra.mxu3 %v780_v52  ;;  %v869_v52 = vsel %vm570_vm1, %v866_v47, %v868_v62 }
 0x156   : > { %v628_v49 = vpop.f32.mrf.mxu2 }
 0x157   : > { %v662_v33 = vadd.f32 %v628_v49, %v521_v29  ;;  %v1133_v29 = vrot.slane %v2436_v26, 2 }
 0x158   : > { %v523_v31 = vpop.f32.mrf.mxu1 }
 0x159   : > { %v524_v27 = vadd.f32 %v523_v31, %v470_v63  ;;  %v744_v32 = vadd.f32 %v710_v3, %v662_v33  ;;  %v1137_v63 = vrot.slane %v362_v35, 2  ;;  %v1134_v33 = vsel %vm570_vm1, %v870_v7, %v1133_v29 }
 0x15a   : > { %v804_v34 = vpop.f32.mrf.mxu0 }
 0x15b   : > { %v2439_v40 = vadd.f32 %v804_v34, %v744_v32  ;;  %909 = vmatmul.f32.gmra.mxu1 %v2359_v56  ;;  %991 = vmatmul.f32.gmra.mxu2 %v2228_v30  ;;  %v1045_v56 = vsel %vm409_vm0, %v1042_v38, %v1044_v55  ;;  %v1046_v30 = vrot.slane %v362_v35, 1 }
 0x15d   : > { %1173 = vmatmul.f32.gmra.mxu0 %v2386_v5  ;;  %1094 = vmatmul.f32.gmra.mxu3 %v1043_v4 }
 0x15e   : > { %v631_v45 = vpop.f32.mrf.mxu2 }
 0x15f   : > { %v663_v50 = vadd.f32 %v631_v45, %v524_v27 }
 0x160   : > { %v526_v51 = vpop.f32.mrf.mxu1  ;;  %v722_v59 = vpop.f32.mrf.mxu3 }
 0x161   : > { %v527_v57 = vadd.f32 %v526_v51, %v473_v16  ;;  %v745_v37 = vadd.f32 %v713_v17, %v663_v50  ;;  %v871_v17 = vsel %vm570_vm1, %v868_v62, %v870_v7 }
 0x162   : > { %v807_v58 = vpop.f32.mrf.mxu0 }
 0x163   : > { %v2454_v39 = vadd.f32 %v807_v58, %v745_v37  ;;  %912 = vmatmul.f32.gmra.mxu1 %v2372_v1  ;;  %994 = vmatmul.f32.gmra.mxu2 %v2339_v54  ;;  %v1047_v54 = vsel %vm409_vm0, %v1044_v55, %v1046_v30 }
 0x165   : > { %1176 = vmatmul.f32.gmra.mxu0 %v867_v46  ;;  %1097 = vmatmul.f32.gmra.mxu3 %v1045_v56 }
 0x166   : > { %v634_v61 = vpop.f32.mrf.mxu2 }
 0x167   : > { %v664_v8 = vadd.f32 %v634_v61, %v527_v57 }
 0x168   : > { %v529_v21 = vpop.f32.mrf.mxu1  ;;  %v725_v1 = vpop.f32.mrf.mxu3 }
 0x169   : > { %v530_v2 = vadd.f32 %v529_v21, %v2394_v9  ;;  %v746_v41 = vadd.f32 %v716_v23, %v664_v8 }
 0x16a   : > { %v810_v42 = vpop.f32.mrf.mxu0 }
 0x16b   : > { %v2462_v13 = vadd.f32 %v810_v42, %v746_v41  ;;  %915 = vmatmul.f32.gmra.mxu1 %v2386_v5  ;;  %997 = vmatmul.f32.gmra.mxu2 %v2352_v60  ;;  %v1135_v5 = vrot.slane %v2447_v44, 2 }
 0x16d   : > { %1179 = vmatmul.f32.gmra.mxu0 %v869_v52  ;;  %1100 = vmatmul.f32.gmra.mxu3 %v1047_v54  ;;  %v1138_v18 = vsel %vm570_vm1, %v1135_v5, %v1137_v63 }
 0x16e   : > { %v637_v48 = vpop.f32.mrf.mxu2 }
 0x16f   : > { %v665_v3 = vadd.f32 %v637_v48, %v530_v2 }
 0x170   : > { %v532_v9 = vpop.f32.mrf.mxu1  ;;  %v728_v53 = vpop.f32.mrf.mxu3 }
 0x171   : > { %v533_v28 = vadd.f32 %v532_v9, %v2404_v11  ;;  %v747_v15 = vadd.f32 %v719_v36, %v665_v3 }
 0x172   : > { %v813_v16 = vpop.f32.mrf.mxu0 }
 0x173   : > { %v2471_v60 = vadd.f32 %v813_v16, %v747_v15  ;;  %918 = vmatmul.f32.gmra.mxu1 %v867_v46  ;;  %1000 = vmatmul.f32.gmra.mxu2 %v2391_v6 }
 0x175   : > { %1182 = vmatmul.f32.gmra.mxu0 %v871_v17  ;;  %1191 = vmatmul.f32.vlgmr.msra.gmra.mxu3 %v1138_v18 }
 0x176   : > { %v640_v19 = vpop.f32.mrf.mxu2 }
 0x177   : > { %v666_v25 = vadd.f32 %v640_v19, %v533_v28 }
 0x178   : > { %v535_v11 = vpop.f32.mrf.mxu1  ;;  %v731_v31 = vpop.f32.mrf.mxu3 }
 0x179   : > { %v536_v20 = vadd.f32 %v535_v11, %v2412_v14  ;;  %v748_v23 = vadd.f32 %v722_v59, %v666_v25  ;;  %v1136_v14 = vsel %vm570_vm1, %v1133_v29, %v1135_v5 }
 0x17a   : > { %v816_v49 = vpop.f32.mrf.mxu0 }
 0x17b   : > { %v2478_v38 = vadd.f32 %v816_v49, %v748_v23  ;;  %921 = vmatmul.f32.gmra.mxu1 %v869_v52  ;;  %1003 = vmatmul.f32.gmra.mxu2 %v2436_v26  ;;  %v2502_v23 = vld [vmem:[%s2084_s12] ss:$0 sm:$0xff]  ;;  %s1259_s12 = smul.u32 12, %s1886_s21 }
 0x17d   : > { %1185 = vmatmul.f32.gmra.mxu0 %v1134_v33  ;;  %s1263_s11 = sadd.s32 %s1485_s13, %s1259_s12 }
 0x17e   : > { %v643_v6 = vpop.f32.mrf.mxu2  ;;  %s1428_s21 = sshll.u32 %s1263_s11, 3 }
 0x17f   : > { %v667_v27 = vadd.f32 %v643_v6, %v536_v20  ;;  %s1265_s5 = scalar_lea.hbm %s2617_s4, %s1428_s21 }
 0x180   : > { %v538_v32 = vpop.f32.mrf.mxu1  ;;  %v734_v45 = vpop.f32.mrf.mxu3  ;;  %s1268_s24 = sshll.u32 %s1265_s5, 4  ;;  %s1269_s24 = int_to_ptr.hbm [resolvable:$true] %s1268_s24 }
 0x181   : > { %v539_v34 = vadd.f32 %v538_v32, %v2420_v12  ;;  %v749_v36 = vadd.f32 %v725_v1, %v667_v27  ;;  %s1780_s1 = sshra.s32 %s1269_s24, 4  ;;  %s1781_s1 = int_to_ptr.hbm [resolvable:$true] %s1780_s1 }
 0x182   : > { %v819_v4 = vpop.f32.mrf.mxu0  ;;  %s1782_s2 = scalar_lea.hbm %s1781_s1, 96  ;;  %p1787_p12 = scmp.lt.s32.totalorder %s1781_s1, %s2617_s4 }
 0x183   : > { %v2483_v47 = vadd.f32 %v819_v4, %v749_v36  ;;  %924 = vmatmul.f32.gmra.mxu1 %v871_v17  ;;  %1006 = vmatmul.f32.gmra.mxu2 %v2447_v44  ;;  %p1783_p3 = scmp.ne.s32.totalorder %s1781_s1, %s1782_s2  ;;  %p1788_p13 = scmp.lt.s32.totalorder %s1786_s20, %s1782_s2 }
 0x185   : > { %1188 = vmatmul.f32.gmra.mxu0 %v1136_v14  ;;  %p1784_p5 = pnand %p1783_p3, %p2055_p7  ;;  %p1789_p0 = por %p1788_p13, %p1787_p12 }
 0x186   : > { %v646_v50 = vpop.f32.mrf.mxu2 }
 0x187   : > { %v668_v51 = vadd.f32 %v646_v50, %v539_v34  ;;  %p1785_p11 = pneg %p1784_p5 }
 0x188   : > { %v541_v26 = vpop.f32.mrf.mxu1  ;;  %v737_v37 = vpop.f32.mrf.mxu3 }
 0x189   : > { %v750_v55 = vadd.f32 %v728_v53, %v668_v51  ;;  %v542_v12 = vadd.f32 %v541_v26, %v2402_v10  ;;  %p1790_p6 = pnand %p1789_p0, %p1785_p11 }
 0x18a   : > { %v822_v57 = vpop.f32.mrf.mxu0 }
 0x18b   : > { %v2486_v58 = vadd.f32 %v822_v57, %v750_v55 }
 0x18e   : > { %v649_v46 = vpop.f32.mrf.mxu2 }
 0x18f   : > { %v669_v59 = vadd.f32 %v649_v46, %v542_v12 }
 0x190   : > { %v544_v56 = vpop.f32.mrf.mxu1  ;;  %v740_v62 = vpop.f32.mrf.mxu3 }
 0x191   : > { %v751_v35 = vadd.f32 %v731_v31, %v669_v59  ;;  %v545_v44 = vadd.f32 %v544_v56, %v2410_v43  ;;  %v2509_v31 = vld [vmem:[%s2652_s6] ss:$0 sm:$0xff] }
 0x192   : > { %v825_v61 = vpop.f32.mrf.mxu0 }
 0x193   : > { %v2489_v8 = vadd.f32 %v825_v61, %v751_v35 }
 0x196   : > { %v652_v21 = vpop.f32.mrf.mxu2 }
 0x197   : > { %v670_v30 = vadd.f32 %v652_v21, %v545_v44 }
 0x198   : > { %v547_v2 = vpop.f32.mrf.mxu1  ;;  %v1068_v52 = vpop.f32.mrf.mxu3 }
 0x199   : > { %v752_v41 = vadd.f32 %v734_v45, %v670_v30  ;;  %v548_v10 = vadd.f32 %v547_v2, %v2418_v0 }
 0x19a   : > { %v828_v42 = vpop.f32.mrf.mxu0 }
 0x19b   : > { %v2492_v1 = vadd.f32 %v828_v42, %v752_v41 }
 0x19e   : > { %v655_v54 = vpop.f32.mrf.mxu2 }
 0x19f   : > { %v671_v48 = vadd.f32 %v655_v54, %v548_v10 }
 0x1a0   : > { %v550_v7 = vpop.f32.mrf.mxu1  ;;  %v1071_v63 = vpop.f32.mrf.mxu3 }
 0x1a1   : > { %v753_v3 = vadd.f32 %v737_v37, %v671_v48  ;;  %v551_v43 = vadd.f32 %v550_v7, %v2426_v22 }
 0x1a2   : > { %v831_v9 = vpop.f32.mrf.mxu0 }
 0x1a3   : > { %v2495_v28 = vadd.f32 %v831_v9, %v753_v3 }
 0x1a6   : > { %v658_v15 = vpop.f32.mrf.mxu2 }
 0x1a7   : > { %v672_v16 = vadd.f32 %v658_v15, %v551_v43 }
 0x1a8   : > { %v892_v17 = vpop.f32.mrf.mxu1  ;;  %v1074_v18 = vpop.f32.mrf.mxu3 }
 0x1a9   : > { %v754_v53 = vadd.f32 %v740_v62, %v672_v16  ;;  %v928_v0 = vadd.f32 %v892_v17, %v2431_v24 }
 0x1aa   : > { %v834_v5 = vpop.f32.mrf.mxu0 }
 0x1ab   : > { %v2498_v19 = vadd.f32 %v834_v5, %v754_v53 }
 0x1ae   : > { %v974_v29 = vpop.f32.mrf.mxu2 }
 0x1af   : > { %v1010_v25 = vadd.f32 %v974_v29, %v928_v0 }
 0x1b0   : > { %v895_v11 = vpop.f32.mrf.mxu1  ;;  %v1077_v22 = vpop.f32.mrf.mxu3 }
 0x1b1   : > { %v1104_v20 = vadd.f32 %v1068_v52, %v1010_v25  ;;  %v929_v6 = vadd.f32 %v895_v11, %v2439_v40 }
 0x1b2   : > { %v1159_v49 = vpop.f32.mrf.mxu0 }
 0x1b3   : > { %v1195_v33 = vadd.f32 %v1159_v49, %v1104_v20 }
 0x1b5   : > { %v1211_v24 = vmul.f32 %v2502_v23, %v1195_v33 }
 0x1b6   : > { %v977_v27 = vpop.f32.mrf.mxu2 }
 0x1b7   : > { %v1227_v32 = vadd.f32 %v2509_v31, %v1211_v24  ;;  %v1011_v34 = vadd.f32 %v977_v27, %v929_v6 }
 0x1b8   : > { %v898_v36 = vpop.f32.mrf.mxu1  ;;  %v1080_v45 = vpop.f32.mrf.mxu3 }
 0x1b9   : > { %1239 = vst [vmem:[%s2148_s17] sm:$0xff] %v1227_v32  ;;  %v1105_v4 = vadd.f32 %v1071_v63, %v1011_v34  ;;  %v930_v51 = vadd.f32 %v898_v36, %v2454_v39 }
 0x1ba   : > { %v1162_v14 = vpop.f32.mrf.mxu0 }
 0x1bb   : > { %v1196_v50 = vadd.f32 %v1162_v14, %v1105_v4 }
 0x1bd   : > { %v1212_v26 = vmul.f32 %v2502_v23, %v1196_v50 }
 0x1be   : > { %v980_v55 = vpop.f32.mrf.mxu2 }
 0x1bf   : > { %v1228_v40 = vadd.f32 %v2509_v31, %v1212_v26  ;;  %v1012_v57 = vadd.f32 %v980_v55, %v930_v51 }
 0x1c0   : > { %v901_v37 = vpop.f32.mrf.mxu1  ;;  %v1083_v59 = vpop.f32.mrf.mxu3 }
 0x1c1   : > { %1240 = vst [vmem:[%s2148_s17 + $0x8] sm:$0xff] %v1228_v40  ;;  %v1106_v12 = vadd.f32 %v1074_v18, %v1012_v57  ;;  %v931_v35 = vadd.f32 %v901_v37, %v2462_v13 }
 0x1c2   : > { %v1165_v46 = vpop.f32.mrf.mxu0 }
 0x1c3   : > { %v1197_v56 = vadd.f32 %v1165_v46, %v1106_v12 }
 0x1c5   : > { %v1213_v61 = vmul.f32 %v2502_v23, %v1197_v56 }
 0x1c6   : > { %v983_v62 = vpop.f32.mrf.mxu2 }
 0x1c7   : > { %v1229_v39 = vadd.f32 %v2509_v31, %v1213_v61  ;;  %v1013_v44 = vadd.f32 %v983_v62, %v931_v35 }
 0x1c8   : > { %v904_v21 = vpop.f32.mrf.mxu1  ;;  %v1086_v42 = vpop.f32.mrf.mxu3 }
 0x1c9   : > { %1241 = vst [vmem:[%s2148_s17 + $0x10] sm:$0xff] %v1229_v39  ;;  %v1107_v30 = vadd.f32 %v1077_v22, %v1013_v44  ;;  %v932_v52 = vadd.f32 %v904_v21, %v2471_v60 }
 0x1ca   : > { %v1168_v2 = vpop.f32.mrf.mxu0 }
 0x1cb   : > { %v1198_v41 = vadd.f32 %v1168_v2, %v1107_v30 }
 0x1cd   : > { %v1214_v10 = vmul.f32 %v2502_v23, %v1198_v41 }
 0x1ce   : > { %v986_v54 = vpop.f32.mrf.mxu2 }
 0x1cf   : > { %v1230_v13 = vadd.f32 %v2509_v31, %v1214_v10  ;;  %v1014_v48 = vadd.f32 %v986_v54, %v932_v52 }
 0x1d0   : > { %v907_v7 = vpop.f32.mrf.mxu1  ;;  %v1089_v17 = vpop.f32.mrf.mxu3 }
 0x1d1   : > { %1242 = vst [vmem:[%s2148_s17 + $0x18] sm:$0xff] %v1230_v13  ;;  %v1108_v3 = vadd.f32 %v1080_v45, %v1014_v48  ;;  %v933_v43 = vadd.f32 %v907_v7, %v2478_v38 }
 0x1d2   : > { %v1171_v9 = vpop.f32.mrf.mxu0 }
 0x1d3   : > { %v1199_v63 = vadd.f32 %v1171_v9, %v1108_v3 }
 0x1d5   : > { %v1215_v15 = vmul.f32 %v2502_v23, %v1199_v63 }
 0x1d6   : > { %v989_v16 = vpop.f32.mrf.mxu2 }
 0x1d7   : > { %v1231_v60 = vadd.f32 %v2509_v31, %v1215_v15  ;;  %v1015_v53 = vadd.f32 %v989_v16, %v933_v43 }
 0x1d8   : > { %v910_v5 = vpop.f32.mrf.mxu1  ;;  %v1092_v33 = vpop.f32.mrf.mxu3 }
 0x1d9   : > { %1243 = vst [vmem:[%s2148_s17 + $0x20] sm:$0xff] %v1231_v60  ;;  %v1109_v18 = vadd.f32 %v1083_v59, %v1015_v53  ;;  %v934_v25 = vadd.f32 %v910_v5, %v2483_v47 }
 0x1da   : > { %v1174_v0 = vpop.f32.mrf.mxu0 }
 0x1db   : > { %v1200_v29 = vadd.f32 %v1174_v0, %v1109_v18 }
 0x1dd   : > { %v1216_v11 = vmul.f32 %v2502_v23, %v1200_v29 }
 0x1de   : > { %v992_v20 = vpop.f32.mrf.mxu2 }
 0x1df   : > { %v1232_v38 = vadd.f32 %v2509_v31, %v1216_v11  ;;  %v1016_v49 = vadd.f32 %v992_v20, %v934_v25 }
 0x1e0   : > { %v913_v22 = vpop.f32.mrf.mxu1  ;;  %v1095_v51 = vpop.f32.mrf.mxu3 }
 0x1e1   : > { %1244 = vst [vmem:[%s2148_s17 + $0x28] sm:$0xff] %v1232_v38  ;;  %v1110_v6 = vadd.f32 %v1086_v42, %v1016_v49  ;;  %v935_v32 = vadd.f32 %v913_v22, %v2486_v58 }
 0x1e2   : > { %v1177_v24 = vpop.f32.mrf.mxu0 }
 0x1e3   : > { %v1201_v27 = vadd.f32 %v1177_v24, %v1110_v6 }
 0x1e5   : > { %v1217_v34 = vmul.f32 %v2502_v23, %v1201_v27 }
 0x1e6   : > { %v995_v36 = vpop.f32.mrf.mxu2 }
 0x1e7   : > { %v1233_v47 = vadd.f32 %v2509_v31, %v1217_v34  ;;  %v1017_v4 = vadd.f32 %v995_v36, %v935_v32 }
 0x1e8   : > { %v916_v14 = vpop.f32.mrf.mxu1  ;;  %v1098_v35 = vpop.f32.mrf.mxu3 }
 0x1e9   : > { %1245 = vst [vmem:[%s2148_s17 + $0x30] sm:$0xff] %v1233_v47  ;;  %v1111_v45 = vadd.f32 %v1089_v17, %v1017_v4  ;;  %v936_v55 = vadd.f32 %v916_v14, %v2489_v8 }
 0x1ea   : > { %v1180_v50 = vpop.f32.mrf.mxu0 }
 0x1eb   : > { %v1202_v26 = vadd.f32 %v1180_v50, %v1111_v45 }
 0x1ed   : > { %v1218_v40 = vmul.f32 %v2502_v23, %v1202_v26 }
 0x1ee   : > { %v998_v57 = vpop.f32.mrf.mxu2 }
 0x1ef   : > { %v1234_v58 = vadd.f32 %v2509_v31, %v1218_v40  ;;  %v1018_v37 = vadd.f32 %v998_v57, %v936_v55 }
 0x1f0   : > { %v919_v12 = vpop.f32.mrf.mxu1  ;;  %v1101_v54 = vpop.f32.mrf.mxu3 }
 0x1f1   : > { %1246 = vst [vmem:[%s2148_s17 + $0x38] sm:$0xff] %v1234_v58  ;;  %v1112_v46 = vadd.f32 %v1092_v33, %v1018_v37  ;;  %v937_v61 = vadd.f32 %v919_v12, %v2492_v1 }
 0x1f2   : > { %v1183_v59 = vpop.f32.mrf.mxu0 }
 0x1f3   : > { %v1203_v56 = vadd.f32 %v1183_v59, %v1112_v46 }
 0x1f5   : > { %v1219_v62 = vmul.f32 %v2502_v23, %v1203_v56 }
 0x1f6   : > { %v1001_v8 = vpop.f32.mrf.mxu2 }
 0x1f7   : > { %v1235_v39 = vadd.f32 %v2509_v31, %v1219_v62  ;;  %v1019_v44 = vadd.f32 %v1001_v8, %v937_v61 }
 0x1f8   : > { %v922_v21 = vpop.f32.mrf.mxu1  ;;  %v1192_v17 = vpop.f32.mrf.mxu3 }
 0x1f9   : > { %1247 = vst [vmem:[%s2148_s17 + $0x40] sm:$0xff] %v1235_v39  ;;  %v1113_v30 = vadd.f32 %v1095_v51, %v1019_v44  ;;  %v938_v42 = vadd.f32 %v922_v21, %v2495_v28 }
 0x1fa   : > { %v1186_v2 = vpop.f32.mrf.mxu0 }
 0x1fb   : > { %v1204_v41 = vadd.f32 %v1186_v2, %v1113_v30 }
 0x1fd   : > { %v1220_v52 = vmul.f32 %v2502_v23, %v1204_v41 }
 0x1fe   : > { %v1004_v10 = vpop.f32.mrf.mxu2 }
 0x1ff   : > { %v1236_v1 = vadd.f32 %v2509_v31, %v1220_v52  ;;  %v1020_v13 = vadd.f32 %v1004_v10, %v938_v42 }
 0x200   : > { %v925_v7 = vpop.f32.mrf.mxu1 }
 0x201   : > { %1248 = vst [vmem:[%s2148_s17 + $0x48] sm:$0xff] %v1236_v1  ;;  %v1114_v48 = vadd.f32 %v1098_v35, %v1020_v13  ;;  %v939_v63 = vadd.f32 %v925_v7, %v2498_v19 }
 0x202   : > { %v1189_v3 = vpop.f32.mrf.mxu0 }
 0x203   : > { %v1205_v9 = vadd.f32 %v1189_v3, %v1114_v48 }
 0x205   : > { %v1221_v28 = vmul.f32 %v2502_v23, %v1205_v9 }
 0x206   : > { %v1007_v43 = vpop.f32.mrf.mxu2 }
 0x207   : > { %v1237_v15 = vadd.f32 %v2509_v31, %v1221_v28  ;;  %v1021_v16 = vadd.f32 %v1007_v43, %v939_v63 }
 0x209   : > { %1249 = vst [vmem:[%s2148_s17 + $0x50] sm:$0xff] %v1237_v15  ;;  %v1115_v60 = vadd.f32 %v1101_v54, %v1021_v16 }
 0x20b   : > { %v1206_v53 = vadd.f32 %v1192_v17, %v1115_v60 }
 0x20d   : > { %v1222_v19 = vmul.f32 %v2502_v23, %v1206_v53 }
 0x20f   : > { %v1238_v5 = vadd.f32 %v2509_v31, %v1222_v19 }
 0x211   : > { %1250 = vst [vmem:[%s2148_s17 + $0x58] sm:$0xff] %v1238_v5 }
 0x212   : > { %1793 = shalt.err (!%p1790_p6)
}
 0x213   : > { %s1916_s28 = smov 128   ;;  %s1917_s15 = smov 8  }
 0x214   : > { %1500 = dma.vmem_to_hbm [thread:$0]  (%p2055_p7), %s1267_s7, 1536, %s1269_s24, %s1252_s26, %s1916_s28, %s1916_s28, %s1917_s15  }
 0x215 PF: > { %s2654_s18 = sld [smem:[#allocation23_spill]]  ;;  %p1521_p8 = scmp.ge.s32.totalorder %s1902_s25, 2 }
 0x217   : > { %p1511_p9 = pnand %p1521_p8, %p2071_p10 }
 0x219   : > { %p1512_p2 = pneg %p1511_p9 }
 0x21b   : > { %s1283_s10 = sand.u32 1, %s2654_s18  }
 0x21c   : > { %s1284_s27 = scalar_lea.sflag [#allocation6], %s1283_s10 }
 0x21d   : > { %1857 = dma.done.wait (%p1512_p2), %s1284_s27, 1536  }
 0x21e   : > { %1859 = vsyncadd (%p1512_p2), %s1284_s27, 4294965760  ;;  %s21_s25 = sadd.s32 1, %s1902_s25   ;;  %s2656_s6 = sld [smem:[#allocation24_spill]] }
 0x21f   : > { %p18_p1 = scmp.ge.s32.totalorder %s21_s25, 10   ;;  %s2657_s17 = sld [smem:[#allocation32_spill]] }
 0x220   : > { %s2658_s18 = sld [smem:[#allocation25_spill]]  ;;  %s2665_s15 = smov %s1866_s16 }
 0x221   : > { %s2659_s19 = sld [smem:[#allocation26_spill]] }
 0x222   : > { %s2660_s20 = sld [smem:[#allocation31_spill]]  ;;  %20 = sbr.rel (!%p18_p1) target bundleno = 13 (0xd), region = 139 }
 0x223   : > { %s2661_s21 = sld [smem:[#allocation27_spill]] }
 0x224   : > { %s2662_s22 = sld [smem:[#allocation28_spill]]  ;;  %s2666_s16 = smov %s2656_s6 }
 0x225   : > { %s2663_s23 = sld [smem:[#allocation29_spill]] }
 0x226   : > { %s2664_s24 = sld [smem:[#allocation30_spill]] }
 0x227   :  { %1290 = vsyncpa [#allocation5], 1 }
 0x228   :  { %1292 = vsyncpa [#allocation5 + $0x1], 1 }
 0x229   :  { %1293 = vsyncpa [#allocation8], 1 }
 0x22a   :  { %1295 = vsyncpa [#allocation8 + $0x1], 1 }
 0x22b   :  { %1296 = vsyncpa [#allocation6], 1 }
 0x22c   :  { %1298 = vsyncpa [#allocation6 + $0x1], 1 }
 0x22d   :  { %1299 = vsyncmov [#allocation3] }
 0x230   :  { %s1300_s8 = vpop.sfrf %1299 }
 0x231   :  { %p1431_p7 = scmp.ne.s32.totalorder %s1300_s8, 0 }
 0x233   :  { %1304 = shalt.err (%p1431_p7)  }
 0x234   :  { %1306 = vsyncmov [#allocation3 + $0x1] }
 0x237   :  { %s1307_s12 = vpop.sfrf %1306 }
 0x238   :  { %p1432_p10 = scmp.ne.s32.totalorder %s1307_s12, 0 }
 0x23a   :  { %1311 = shalt.err (%p1432_p10)  }
 0x23b   :  { %1313 = vsyncmov [#allocation3 + $0x2] }
 0x23e   :  { %s1314_s13 = vpop.sfrf %1313 }
 0x23f   :  { %p1433_p4 = scmp.ne.s32.totalorder %s1314_s13, 0 }
 0x241   :  { %1318 = shalt.err (%p1433_p4)  }

</bundles_post_ra>
